<compile_context>
chip_gen: v6e
topology: v6e:2x2x1
jax: 0.10.0
libtpu: 0.0.40
codegen_flags: <defaults>
</compile_context>

<pallas_src>
import functools
import math

import jax
import jax.numpy as jnp
from jax import lax
from jax.experimental import pallas as pl
from jax.experimental.pallas import tpu as pltpu

# MXU operands in bf16 (f32 accumulation).  All elementwise epilogue math
# (bias, ReLU, LayerNorm, softmax) stays f32 (v5e has no bf16 VPU/EUP path).
MXU_DTYPE = jnp.bfloat16

# Explicit scoped-VMEM budget: comfortably below v7x's 64 MiB physical VMEM
# and far above what the double-buffered tiles below need.
VMEM_LIMIT_BYTES = 32 * 1024 * 1024

LN_EPS = 1e-5  # PyTorch nn.LayerNorm default


def _cparams(dims):
    return pltpu.CompilerParams(dimension_semantics=dims,
                                vmem_limit_bytes=VMEM_LIMIT_BYTES)


def _pick_tile(dim, preferred, align):
    """Largest multiple of `align` that divides `dim` and is <= `preferred`.
    Falls back to the full dim (always legal: block == array extent)."""
    if dim <= preferred:
        return dim
    t = (preferred // align) * align
    while t >= align:
        if dim % t == 0:
            return t
        t -= align
    return dim


# ---------------------------------------------------------------------------
# Fused, tiled matmul kernels
# ---------------------------------------------------------------------------

def matmul_bias(x, w, b, *, activation=None, tm=256, tn=256, tk=512):
    """y = act(x @ w + b).  x: (M, K) f32, w: (K, N) bf16 (pre-transposed),
    b: (1, N) f32.  Tiled grid with f32 VMEM accumulator + fused epilogue."""
    M, K = x.shape
    Kw, Nout = w.shape
    assert K == Kw
    tm = _pick_tile(M, tm, 8)
    tn = _pick_tile(Nout, tn, 128)
    tk = _pick_tile(K, tk, 128)
    grid = (M // tm, Nout // tn, K // tk)

    def kernel(x_ref, w_ref, b_ref, o_ref, acc_ref):
        k = pl.program_id(2)

        @pl.when(k == 0)
        def _init():
            acc_ref[...] = jnp.zeros_like(acc_ref)

        acc_ref[...] += jnp.dot(x_ref[...].astype(MXU_DTYPE),
                                w_ref[...].astype(MXU_DTYPE),
                                preferred_element_type=jnp.float32)

        @pl.when(k == pl.num_programs(2) - 1)
        def _finalize():
            y = acc_ref[...] + b_ref[...]
            if activation == "relu":
                y = jnp.maximum(y, 0.0)
            o_ref[...] = y.astype(o_ref.dtype)

    return pl.pallas_call(
        kernel,
        out_shape=jax.ShapeDtypeStruct((M, Nout), jnp.float32),
        grid=grid,
        in_specs=[
            pl.BlockSpec((tm, tk), lambda i, j, k: (i, k)),
            pl.BlockSpec((tk, tn), lambda i, j, k: (k, j)),
            pl.BlockSpec((1, tn), lambda i, j, k: (0, j)),
        ],
        out_specs=pl.BlockSpec((tm, tn), lambda i, j, k: (i, j)),
        scratch_shapes=[pltpu.VMEM((tm, tn), jnp.float32)],
        compiler_params=_cparams(("parallel", "parallel", "arbitrary")),
    )(x, w, b)


def matmul_residual_layernorm(x, w, b, residual, gamma, beta, *, tm=256, tk=512):
    """LayerNorm(residual + x @ w + b), LN fused into the matmul epilogue.
    Output width is the full D so the LN row reduction stays in-tile."""
    M, K = x.shape
    Kw, D = w.shape
    assert K == Kw and residual.shape == (M, D)
    tm = _pick_tile(M, tm, 8)
    tk = _pick_tile(K, tk, 128)
    grid = (M // tm, K // tk)

    def kernel(x_ref, w_ref, b_ref, r_ref, g_ref, bb_ref, o_ref, acc_ref):
        k = pl.program_id(1)

        @pl.when(k == 0)
        def _init():
            acc_ref[...] = jnp.zeros_like(acc_ref)

        acc_ref[...] += jnp.dot(x_ref[...].astype(MXU_DTYPE),
                                w_ref[...].astype(MXU_DTYPE),
                                preferred_element_type=jnp.float32)

        @pl.when(k == pl.num_programs(1) - 1)
        def _finalize():
            y = acc_ref[...] + b_ref[...] + r_ref[...]
            mu = jnp.mean(y, axis=-1, keepdims=True)
            var = jnp.mean(jnp.square(y - mu), axis=-1, keepdims=True)
            o_ref[...] = ((y - mu) * lax.rsqrt(var + LN_EPS) * g_ref[...]
                          + bb_ref[...]).astype(o_ref.dtype)

    return pl.pallas_call(
        kernel,
        out_shape=jax.ShapeDtypeStruct((M, D), jnp.float32),
        grid=grid,
        in_specs=[
            pl.BlockSpec((tm, tk), lambda i, k: (i, k)),
            pl.BlockSpec((tk, D), lambda i, k: (k, 0)),
            pl.BlockSpec((1, D), lambda i, k: (0, 0)),
            pl.BlockSpec((tm, D), lambda i, k: (i, 0)),
            pl.BlockSpec((1, D), lambda i, k: (0, 0)),
            pl.BlockSpec((1, D), lambda i, k: (0, 0)),
        ],
        out_specs=pl.BlockSpec((tm, D), lambda i, k: (i, 0)),
        scratch_shapes=[pltpu.VMEM((tm, D), jnp.float32)],
        compiler_params=_cparams(("parallel", "arbitrary")),
    )(x, w, b, residual, gamma, beta)


# ---------------------------------------------------------------------------
# Flash-style causal attention (online softmax, causal block skipping)
# ---------------------------------------------------------------------------

def flash_attention(q, k, v, *, scale, tile=256):
    """Causal attention.  q, k, v: (BH, S, dh) f32 -> (BH, S, dh) f32.
    grid = (head, q-tile, kv-tile); kv is the reduction axis ("arbitrary");
    fully-masked kv tiles are skipped; no (S, S) score/mask tensor is built."""
    BH, S, dh = q.shape
    t = _pick_tile(S, tile, 8)
    tq = tk = t  # equal tiles => every live query row has >= 1 unmasked key

    def kernel(q_ref, k_ref, v_ref, o_ref, m_sc, l_sc, acc_sc):
        qi = pl.program_id(1)
        ki = pl.program_id(2)

        @pl.when(ki == 0)
        def _init():
            m_sc[...] = jnp.full_like(m_sc, -1e30)
            l_sc[...] = jnp.zeros_like(l_sc)
            acc_sc[...] = jnp.zeros_like(acc_sc)

        # Skip kv tiles that lie entirely above the causal diagonal.
        @pl.when(ki * tk <= qi * tq + (tq - 1))
        def _process():
            s = lax.dot_general(
                q_ref[...].astype(MXU_DTYPE), k_ref[...].astype(MXU_DTYPE),
                (((1,), (1,)), ((), ())),
                preferred_element_type=jnp.float32) * scale          # (tq, tk)
            row = qi * tq + lax.broadcasted_iota(jnp.int32, (tq, tk), 0)
            col = ki * tk + lax.broadcasted_iota(jnp.int32, (tq, tk), 1)
            s = jnp.where(col <= row, s, -1e30)                      # causal
            m_new = jnp.maximum(m_sc[...], jnp.max(s, axis=-1, keepdims=True))
            alpha = jnp.exp(m_sc[...] - m_new)
            p = jnp.exp(s - m_new)
            l_sc[...] = alpha * l_sc[...] + jnp.sum(p, axis=-1, keepdims=True)
            acc_sc[...] = alpha * acc_sc[...] + jnp.dot(
                p.astype(MXU_DTYPE), v_ref[...].astype(MXU_DTYPE),
                preferred_element_type=jnp.float32)
            m_sc[...] = m_new

        @pl.when(ki == pl.num_programs(2) - 1)
        def _finalize():
            o_ref[...] = (acc_sc[...] *
                          pl.reciprocal(l_sc[...], approx=True)).astype(o_ref.dtype)

    return pl.pallas_call(
        kernel,
        out_shape=jax.ShapeDtypeStruct((BH, S, dh), jnp.float32),
        grid=(BH, S // tq, S // tk),
        in_specs=[
            pl.BlockSpec((None, tq, dh), lambda b, qi, ki: (b, qi, 0)),
            pl.BlockSpec((None, tk, dh), lambda b, qi, ki: (b, ki, 0)),
            pl.BlockSpec((None, tk, dh), lambda b, qi, ki: (b, ki, 0)),
        ],
        out_specs=pl.BlockSpec((None, tq, dh), lambda b, qi, ki: (b, qi, 0)),
        scratch_shapes=[
            pltpu.VMEM((tq, 1), jnp.float32),    # running max
            pltpu.VMEM((tq, 1), jnp.float32),    # running denom
            pltpu.VMEM((tq, dh), jnp.float32),   # running numerator
        ],
        compiler_params=_cparams(("parallel", "parallel", "arbitrary")),
    )(q, k, v)


# ---------------------------------------------------------------------------
# Parameters / constants (deterministic synthetic init — no checkpoint)
# ---------------------------------------------------------------------------

def make_positional_encoding(max_len, d_model):
    position = jnp.arange(max_len, dtype=jnp.float32)[:, None]
    div_term = jnp.exp(jnp.arange(0, d_model, 2, dtype=jnp.float32)
                       * (-math.log(10000.0) / d_model))
    pe = jnp.zeros((max_len, d_model), dtype=jnp.float32)
    pe = pe.at[:, 0::2].set(jnp.sin(position * div_term))
    pe = pe.at[:, 1::2].set(jnp.cos(position * div_term))
    return pe


def init_params(key, ntoken, ninp, nhid, nlayers):
    """Weights are stored pre-transposed to (K, N) layout and cast to bf16;
    biases / LN params are pre-reshaped to (1, N) and kept f32."""
    keys = jax.random.split(key, 2 + nlayers)
    initrange = 0.1
    params = {
        "embedding": jax.random.uniform(keys[0], (ntoken, ninp), jnp.float32,
                                        -initrange, initrange),
        "decoder_w": jax.random.uniform(keys[1], (ntoken, ninp), jnp.float32,
                                        -initrange, initrange).T.astype(MXU_DTYPE),
        "decoder_b": jnp.zeros((1, ntoken), jnp.float32),
        "layers": [],
    }
    s = 0.05
    for l in range(nlayers):
        lk = jax.random.split(keys[2 + l], 4)
        params["layers"].append({
            "in_proj_w": jax.random.uniform(lk[0], (3 * ninp, ninp), jnp.float32,
                                            -s, s).T.astype(MXU_DTYPE),
            "in_proj_b": jnp.zeros((1, 3 * ninp), jnp.float32),
            "out_proj_w": jax.random.uniform(lk[1], (ninp, ninp), jnp.float32,
                                             -s, s).T.astype(MXU_DTYPE),
            "out_proj_b": jnp.zeros((1, ninp), jnp.float32),
            "linear1_w": jax.random.uniform(lk[2], (nhid, ninp), jnp.float32,
                                            -s, s).T.astype(MXU_DTYPE),
            "linear1_b": jnp.zeros((1, nhid), jnp.float32),
            "linear2_w": jax.random.uniform(lk[3], (ninp, nhid), jnp.float32,
                                            -s, s).T.astype(MXU_DTYPE),
            "linear2_b": jnp.zeros((1, ninp), jnp.float32),
            "ln1_g": jnp.ones((1, ninp), jnp.float32),
            "ln1_b": jnp.zeros((1, ninp), jnp.float32),
            "ln2_g": jnp.ones((1, ninp), jnp.float32),
            "ln2_b": jnp.zeros((1, ninp), jnp.float32),
        })
    return params


# ---------------------------------------------------------------------------
# Forward pass
# ---------------------------------------------------------------------------

def transformer_forward(params, src, pe, *, ninp, nhead):
    # src: (S, N) int32 token ids  (sequence-first, like the PyTorch module)
    S, N = src.shape
    D = ninp
    H = nhead
    dh = D // H
    assert D % H == 0

    # Embedding lookup is a gather — kept as XLA glue; the sqrt(ninp) scale and
    # positional add fuse into its epilogue (no standalone elementwise kernel).
    # pe[:N] indexed by the *batch* dim reproduces the reference-module quirk.
    emb = jnp.take(params["embedding"], src, axis=0)                 # (S, N, D)
    x = emb * math.sqrt(ninp) + pe[:N][None, :, :]
    # TODO(synk): dropout (p=0.5) omitted — identity in eval mode.

    x2d = x.reshape(S * N, D)
    for layer in params["layers"]:
        # --- self attention (post-norm TransformerEncoderLayer) ---
        qkv = matmul_bias(x2d, layer["in_proj_w"], layer["in_proj_b"])  # (S*N, 3D)
        qkv = qkv.reshape(S, N, 3, H, dh)
        # TODO(synk): head-split (S,N,H,dh)<->(N,H,S,dh) transposes left to XLA.
        q, k, v = (qkv[:, :, i].transpose(1, 2, 0, 3).reshape(N * H, S, dh)
                   for i in range(3))
        attn = flash_attention(q, k, v, scale=1.0 / math.sqrt(dh))      # (N*H,S,dh)
        attn = (attn.reshape(N, H, S, dh)
                    .transpose(2, 0, 1, 3)
                    .reshape(S * N, D))
        # out-proj + bias + residual + LayerNorm1, all fused
        x2d = matmul_residual_layernorm(attn, layer["out_proj_w"],
                                        layer["out_proj_b"], x2d,
                                        layer["ln1_g"], layer["ln1_b"])
        # --- feed forward: linear1+ReLU fused; linear2+residual+LN2 fused ---
        h = matmul_bias(x2d, layer["linear1_w"], layer["linear1_b"],
                        activation="relu")
        x2d = matmul_residual_layernorm(h, layer["linear2_w"],
                                        layer["linear2_b"], x2d,
                                        layer["ln2_g"], layer["ln2_b"])

    # --- decoder projection (vocab axis tiled / double-buffered) ---
    logits = matmul_bias(x2d, params["decoder_w"], params["decoder_b"])
    return logits.reshape(S, N, -1)


# ---------------------------------------------------------------------------
# Main
# ---------------------------------------------------------------------------

if __name__ == "__main__":
    # Small config consistent with the module signature
    ntoken, ninp, nhead, nhid, nlayers = 50, 32, 2, 64, 2
    S, N = 8, 2   # sequence length, batch size (seq-first layout)

    key = jax.random.PRNGKey(0)
    k_param, k_tok = jax.random.split(key)

    params = init_params(k_param, ntoken, ninp, nhid, nlayers)
    pe = make_positional_encoding(max_len=5000, d_model=ninp)
    src = jax.random.randint(k_tok, (S, N), 0, ntoken, dtype=jnp.int32)

    fwd = jax.jit(functools.partial(transformer_forward, ninp=ninp, nhead=nhead))
    out = fwd(params, src, pe)
    out = jax.block_until_ready(out)
    assert out.shape == (S, N, ntoken), out.shape
    assert bool(jnp.all(jnp.isfinite(out)))
    print("KERNEL_OK")
</pallas_src>

<mosaic_0001>
module attributes {stable_mosaic.version = 11 : i64} {
  func.func @kernel(%arg0: i32, %arg1: i32, %arg2: i32, %arg3: memref<16x32xf32, #tpu.memory_space<vmem>>, %arg4: memref<32x96xbf16, #tpu.memory_space<vmem>>, %arg5: memref<1x96xf32, #tpu.memory_space<vmem>>, %arg6: memref<16x96xf32, #tpu.memory_space<vmem>>, %arg7: memref<16x96xf32, #tpu.memory_space<vmem>>) attributes {dimension_semantics = [#tpu.dimension_semantics<parallel>, #tpu.dimension_semantics<parallel>, #tpu.dimension_semantics<arbitrary>], iteration_bounds = array<i64: 1, 1, 1>, scalar_prefetch = 0 : i64, scratch_operands = 1 : i64, tpu.core_type = #tpu.core_type<tc>, window_params = [{transform_indices = @transform_0, window_bounds = array<i64: 16, 32>}, {transform_indices = @transform_1, window_bounds = array<i64: 32, 96>}, {transform_indices = @transform_2, window_bounds = array<i64: 1, 96>}, {transform_indices = @transform_3, window_bounds = array<i64: 16, 96>}]} {
    %c0_i32 = arith.constant 0 : i32
    %0 = arith.cmpi eq, %arg2, %c0_i32 : i32
    %1 = arith.extui %0 : i1 to i32
    %c0_i32_0 = arith.constant 0 : i32
    %2 = arith.cmpi ne, %1, %c0_i32_0 : i32
    scf.if %2 {
      %cst_10 = arith.constant 0.000000e+00 : f32
      %13 = vector.broadcast %cst_10 : f32 to vector<16x96xf32>
      %c0_11 = arith.constant 0 : index
      %c0_12 = arith.constant 0 : index
      %14 = vector.load %arg7[%c0_11, %c0_12] : memref<16x96xf32, #tpu.memory_space<vmem>>, vector<16x96xf32>
      tpu.vector_store %arg7[%c0_11, %c0_12], %13 {strides = array<i32>} : memref<16x96xf32, #tpu.memory_space<vmem>>, vector<16x96xf32>,
    } else {
    }
    %c0 = arith.constant 0 : index
    %c0_1 = arith.constant 0 : index
    %3 = vector.load %arg7[%c0, %c0_1] : memref<16x96xf32, #tpu.memory_space<vmem>>, vector<16x96xf32>
    %c0_2 = arith.constant 0 : index
    %c0_3 = arith.constant 0 : index
    %4 = vector.load %arg3[%c0_2, %c0_3] : memref<16x32xf32, #tpu.memory_space<vmem>>, vector<16x32xf32>
    %5 = arith.truncf %4 : vector<16x32xf32> to vector<16x32xbf16>
    %c0_4 = arith.constant 0 : index
    %c0_5 = arith.constant 0 : index
    %6 = vector.load %arg4[%c0_4, %c0_5] : memref<32x96xbf16, #tpu.memory_space<vmem>>, vector<32x96xbf16>
    %cst = arith.constant dense<0.000000e+00> : vector<16x96xf32>
    %7 = tpu.matmul %5, %6, %cst {dimension_numbers = #tpu.dot_dimension_numbers<[1], [0], [0], [1], [0, 0, 1, 1], [], []>} : vector<16x32xbf16>, vector<32x96xbf16>, vector<16x96xf32> -> vector<16x96xf32>
    %8 = arith.addf %3, %7 : vector<16x96xf32>
    %c0_6 = arith.constant 0 : index
    %c0_7 = arith.constant 0 : index
    %9 = vector.load %arg7[%c0_6, %c0_7] : memref<16x96xf32, #tpu.memory_space<vmem>>, vector<16x96xf32>
    tpu.vector_store %arg7[%c0_6, %c0_7], %8 {strides = array<i32>} : memref<16x96xf32, #tpu.memory_space<vmem>>, vector<16x96xf32>,
    %c0_i32_8 = arith.constant 0 : i32
    %10 = arith.cmpi eq, %arg2, %c0_i32_8 : i32
    %11 = arith.extui %10 : i1 to i32
    %c0_i32_9 = arith.constant 0 : i32
    %12 = arith.cmpi ne, %11, %c0_i32_9 : i32
    scf.if %12 {
      %c0_10 = arith.constant 0 : index
      %c0_11 = arith.constant 0 : index
      %13 = vector.load %arg7[%c0_10, %c0_11] : memref<16x96xf32, #tpu.memory_space<vmem>>, vector<16x96xf32>
      %c0_12 = arith.constant 0 : index
      %c0_13 = arith.constant 0 : index
      %14 = vector.load %arg5[%c0_12, %c0_13] : memref<1x96xf32, #tpu.memory_space<vmem>>, vector<1x96xf32>
      %15 = vector.broadcast %14 : vector<1x96xf32> to vector<16x96xf32>
      %16 = arith.addf %13, %15 : vector<16x96xf32>
      %c0_14 = arith.constant 0 : index
      %c0_15 = arith.constant 0 : index
      %17 = vector.load %arg6[%c0_14, %c0_15] : memref<16x96xf32, #tpu.memory_space<vmem>>, vector<16x96xf32>
      tpu.vector_store %arg6[%c0_14, %c0_15], %16 {strides = array<i32>} : memref<16x96xf32, #tpu.memory_space<vmem>>, vector<16x96xf32>,
    } else {
    }
    return
  }
  func.func @transform_0(%arg0: i32, %arg1: i32, %arg2: i32) -> (i32, i32) {
    %c0_i32 = arith.constant 0 : i32
    return %arg0, %arg2 : i32, i32
  }
  func.func @transform_1(%arg0: i32, %arg1: i32, %arg2: i32) -> (i32, i32) {
    %c0_i32 = arith.constant 0 : i32
    return %arg2, %arg1 : i32, i32
  }
  func.func @transform_2(%arg0: i32, %arg1: i32, %arg2: i32) -> (i32, i32) {
    %c0_i32 = arith.constant 0 : i32
    %c0_i32_0 = arith.constant 0 : i32
    return %c0_i32, %arg1 : i32, i32
  }
  func.func @transform_3(%arg0: i32, %arg1: i32, %arg2: i32) -> (i32, i32) {
    %c0_i32 = arith.constant 0 : i32
    return %arg0, %arg1 : i32, i32
  }
}

module attributes {stable_mosaic.version = 11 : i64} {
  func.func @kernel(%arg0: i32, %arg1: i32, %arg2: i32, %arg3: memref<1x8x16xf32, #tpu.memory_space<vmem>>, %arg4: memref<1x8x16xf32, #tpu.memory_space<vmem>>, %arg5: memref<1x8x16xf32, #tpu.memory_space<vmem>>, %arg6: memref<1x8x16xf32, #tpu.memory_space<vmem>>, %arg7: memref<8x1xf32, #tpu.memory_space<vmem>>, %arg8: memref<8x1xf32, #tpu.memory_space<vmem>>, %arg9: memref<8x16xf32, #tpu.memory_space<vmem>>) attributes {dimension_semantics = [#tpu.dimension_semantics<parallel>, #tpu.dimension_semantics<parallel>, #tpu.dimension_semantics<arbitrary>], iteration_bounds = array<i64: 4, 1, 1>, scalar_prefetch = 0 : i64, scratch_operands = 3 : i64, tpu.core_type = #tpu.core_type<tc>, window_params = [{transform_indices = @transform_0, window_bounds = array<i64: 1, 8, 16>}, {transform_indices = @transform_1, window_bounds = array<i64: 1, 8, 16>}, {transform_indices = @transform_2, window_bounds = array<i64: 1, 8, 16>}, {transform_indices = @transform_3, window_bounds = array<i64: 1, 8, 16>}]} {
    %c0_i32 = arith.constant 0 : i32
    %0 = arith.cmpi eq, %arg2, %c0_i32 : i32
    %1 = arith.extui %0 : i1 to i32
    %c0_i32_0 = arith.constant 0 : i32
    %2 = arith.cmpi ne, %1, %c0_i32_0 : i32
    scf.if %2 {
      %cst = arith.constant -1.000000e+30 : f32
      %12 = vector.broadcast %cst : f32 to vector<8x1xf32>
      %c0 = arith.constant 0 : index
      %c0_5 = arith.constant 0 : index
      %13 = vector.load %arg7[%c0, %c0_5] : memref<8x1xf32, #tpu.memory_space<vmem>>, vector<8x1xf32>
      tpu.vector_store %arg7[%c0, %c0_5], %12 {strides = array<i32>} : memref<8x1xf32, #tpu.memory_space<vmem>>, vector<8x1xf32>,
      %cst_6 = arith.constant 0.000000e+00 : f32
      %14 = vector.broadcast %cst_6 : f32 to vector<8x1xf32>
      %c0_7 = arith.constant 0 : index
      %c0_8 = arith.constant 0 : index
      %15 = vector.load %arg8[%c0_7, %c0_8] : memref<8x1xf32, #tpu.memory_space<vmem>>, vector<8x1xf32>
      tpu.vector_store %arg8[%c0_7, %c0_8], %14 {strides = array<i32>} : memref<8x1xf32, #tpu.memory_space<vmem>>, vector<8x1xf32>,
      %cst_9 = arith.constant 0.000000e+00 : f32
      %16 = vector.broadcast %cst_9 : f32 to vector<8x16xf32>
      %c0_10 = arith.constant 0 : index
      %c0_11 = arith.constant 0 : index
      %17 = vector.load %arg9[%c0_10, %c0_11] : memref<8x16xf32, #tpu.memory_space<vmem>>, vector<8x16xf32>
      tpu.vector_store %arg9[%c0_10, %c0_11], %16 {strides = array<i32>} : memref<8x16xf32, #tpu.memory_space<vmem>>, vector<8x16xf32>,
    } else {
    }
    %c8_i32 = arith.constant 8 : i32
    %3 = arith.muli %arg2, %c8_i32 : i32
    %c8_i32_1 = arith.constant 8 : i32
    %4 = arith.muli %arg1, %c8_i32_1 : i32
    %c7_i32 = arith.constant 7 : i32
    %5 = arith.addi %4, %c7_i32 : i32
    %6 = arith.cmpi sle, %3, %5 : i32
    %7 = arith.extui %6 : i1 to i32
    %c0_i32_2 = arith.constant 0 : i32
    %8 = arith.cmpi ne, %7, %c0_i32_2 : i32
    scf.if %8 {
      %c0 = arith.constant 0 : index
      %c0_5 = arith.constant 0 : index
      %c0_6 = arith.constant 0 : index
      %12 = vector.load %arg3[%c0, %c0_5, %c0_6] : memref<1x8x16xf32, #tpu.memory_space<vmem>>, vector<1x8x16xf32>
      %13 = vector.shape_cast %12 : vector<1x8x16xf32> to vector<8x16xf32>
      %14 = arith.truncf %13 : vector<8x16xf32> to vector<8x16xbf16>
      %c0_7 = arith.constant 0 : index
      %c0_8 = arith.constant 0 : index
      %c0_9 = arith.constant 0 : index
      %15 = vector.load %arg4[%c0_7, %c0_8, %c0_9] : memref<1x8x16xf32, #tpu.memory_space<vmem>>, vector<1x8x16xf32>
      %16 = vector.shape_cast %15 : vector<1x8x16xf32> to vector<8x16xf32>
      %17 = arith.truncf %16 : vector<8x16xf32> to vector<8x16xbf16>
      %cst = arith.constant dense<0.000000e+00> : vector<8x8xf32>
      %18 = tpu.matmul %14, %17, %cst {dimension_numbers = #tpu.dot_dimension_numbers<[1], [1], [0], [0], [0, 0, 1, 0], [], []>} : vector<8x16xbf16>, vector<8x16xbf16>, vector<8x8xf32> -> vector<8x8xf32>
      %cst_10 = arith.constant 2.500000e-01 : f32
      %19 = vector.broadcast %cst_10 : f32 to vector<8x8xf32>
      %20 = arith.mulf %18, %19 : vector<8x8xf32>
      %c8_i32_11 = arith.constant 8 : i32
      %21 = arith.muli %arg1, %c8_i32_11 : i32
      %22 = tpu.iota {dimensions = array<i32: 0>} : vector<8x8xi32>
      %23 = vector.broadcast %21 : i32 to vector<8x8xi32>
      %24 = arith.addi %23, %22 : vector<8x8xi32>
      %c8_i32_12 = arith.constant 8 : i32
      %25 = arith.muli %arg2, %c8_i32_12 : i32
      %26 = tpu.iota {dimensions = array<i32: 1>} : vector<8x8xi32>
      %27 = vector.broadcast %25 : i32 to vector<8x8xi32>
      %28 = arith.addi %27, %26 : vector<8x8xi32>
      %29 = arith.cmpi sle, %28, %24 : vector<8x8xi32>
      %cst_13 = arith.constant -1.000000e+30 : f32
      %30 = vector.broadcast %cst_13 : f32 to vector<8x8xf32>
      %31 = arith.select %29, %20, %30 : vector<8x8xi1>, vector<8x8xf32>
      %c0_14 = arith.constant 0 : index
      %c0_15 = arith.constant 0 : index
      %32 = vector.load %arg7[%c0_14, %c0_15] : memref<8x1xf32, #tpu.memory_space<vmem>>, vector<8x1xf32>
      %cst_16 = arith.constant dense<0xFF800000> : vector<8xf32>
      %33 = vector.multi_reduction <maximumf>, %31, %cst_16 [1] : vector<8x8xf32> to vector<8xf32>
      %34 = vector.shape_cast %33 : vector<8xf32> to vector<8x1xf32>
      %35 = arith.maximumf %32, %34 : vector<8x1xf32>
      %c0_17 = arith.constant 0 : index
      %c0_18 = arith.constant 0 : index
      %36 = vector.load %arg7[%c0_17, %c0_18] : memref<8x1xf32, #tpu.memory_space<vmem>>, vector<8x1xf32>
      %37 = arith.subf %36, %35 : vector<8x1xf32>
      %38 = math.exp %37 : vector<8x1xf32>
      %39 = vector.broadcast %35 : vector<8x1xf32> to vector<8x8xf32>
      %40 = arith.subf %31, %39 : vector<8x8xf32>
      %41 = math.exp %40 : vector<8x8xf32>
      %c0_19 = arith.constant 0 : index
      %c0_20 = arith.constant 0 : index
      %42 = vector.load %arg8[%c0_19, %c0_20] : memref<8x1xf32, #tpu.memory_space<vmem>>, vector<8x1xf32>
      %43 = arith.mulf %38, %42 : vector<8x1xf32>
      %cst_21 = arith.constant dense<0.000000e+00> : vector<8xf32>
      %44 = vector.multi_reduction <add>, %41, %cst_21 [1] : vector<8x8xf32> to vector<8xf32>
      %45 = vector.shape_cast %44 : vector<8xf32> to vector<8x1xf32>
      %46 = arith.addf %43, %45 : vector<8x1xf32>
      %c0_22 = arith.constant 0 : index
      %c0_23 = arith.constant 0 : index
      %47 = vector.load %arg8[%c0_22, %c0_23] : memref<8x1xf32, #tpu.memory_space<vmem>>, vector<8x1xf32>
      tpu.vector_store %arg8[%c0_22, %c0_23], %46 {strides = array<i32>} : memref<8x1xf32, #tpu.memory_space<vmem>>, vector<8x1xf32>,
      %c0_24 = arith.constant 0 : index
      %c0_25 = arith.constant 0 : index
      %48 = vector.load %arg9[%c0_24, %c0_25] : memref<8x16xf32, #tpu.memory_space<vmem>>, vector<8x16xf32>
      %49 = vector.broadcast %38 : vector<8x1xf32> to vector<8x16xf32>
      %50 = arith.mulf %49, %48 : vector<8x16xf32>
      %51 = arith.truncf %41 : vector<8x8xf32> to vector<8x8xbf16>
      %c0_26 = arith.constant 0 : index
      %c0_27 = arith.constant 0 : index
      %c0_28 = arith.constant 0 : index
      %52 = vector.load %arg5[%c0_26, %c0_27, %c0_28] : memref<1x8x16xf32, #tpu.memory_space<vmem>>, vector<1x8x16xf32>
      %53 = vector.shape_cast %52 : vector<1x8x16xf32> to vector<8x16xf32>
      %54 = arith.truncf %53 : vector<8x16xf32> to vector<8x16xbf16>
      %cst_29 = arith.constant dense<0.000000e+00> : vector<8x16xf32>
      %55 = tpu.matmul %51, %54, %cst_29 {dimension_numbers = #tpu.dot_dimension_numbers<[1], [0], [0], [1], [0, 0, 1, 1], [], []>} : vector<8x8xbf16>, vector<8x16xbf16>, vector<8x16xf32> -> vector<8x16xf32>
      %56 = arith.addf %50, %55 : vector<8x16xf32>
      %c0_30 = arith.constant 0 : index
      %c0_31 = arith.constant 0 : index
      %57 = vector.load %arg9[%c0_30, %c0_31] : memref<8x16xf32, #tpu.memory_space<vmem>>, vector<8x16xf32>
      tpu.vector_store %arg9[%c0_30, %c0_31], %56 {strides = array<i32>} : memref<8x16xf32, #tpu.memory_space<vmem>>, vector<8x16xf32>,
      %c0_32 = arith.constant 0 : index
      %c0_33 = arith.constant 0 : index
      %58 = vector.load %arg7[%c0_32, %c0_33] : memref<8x1xf32, #tpu.memory_space<vmem>>, vector<8x1xf32>
      tpu.vector_store %arg7[%c0_32, %c0_33], %35 {strides = array<i32>} : memref<8x1xf32, #tpu.memory_space<vmem>>, vector<8x1xf32>,
    } else {
    }
    %c0_i32_3 = arith.constant 0 : i32
    %9 = arith.cmpi eq, %arg2, %c0_i32_3 : i32
    %10 = arith.extui %9 : i1 to i32
    %c0_i32_4 = arith.constant 0 : i32
    %11 = arith.cmpi ne, %10, %c0_i32_4 : i32
    scf.if %11 {
      %c0 = arith.constant 0 : index
      %c0_5 = arith.constant 0 : index
      %12 = vector.load %arg9[%c0, %c0_5] : memref<8x16xf32, #tpu.memory_space<vmem>>, vector<8x16xf32>
      %c0_6 = arith.constant 0 : index
      %c0_7 = arith.constant 0 : index
      %13 = vector.load %arg8[%c0_6, %c0_7] : memref<8x1xf32, #tpu.memory_space<vmem>>, vector<8x1xf32>
      %14 = tpu.reciprocal %13 {approx = true} : vector<8x1xf32> -> vector<8x1xf32>
      %15 = vector.broadcast %14 : vector<8x1xf32> to vector<8x16xf32>
      %16 = arith.mulf %12, %15 : vector<8x16xf32>
      %c0_8 = arith.constant 0 : index
      %c0_9 = arith.constant 0 : index
      %c0_10 = arith.constant 0 : index
      %17 = vector.load %arg6[%c0_8, %c0_9, %c0_10] : memref<1x8x16xf32, #tpu.memory_space<vmem>>, vector<1x8x16xf32>
      %18 = vector.shape_cast %17 : vector<1x8x16xf32> to vector<8x16xf32>
      %19 = vector.shape_cast %16 : vector<8x16xf32> to vector<1x8x16xf32>
      tpu.vector_store %arg6[%c0_8, %c0_9, %c0_10], %19 {strides = array<i32>} : memref<1x8x16xf32, #tpu.memory_space<vmem>>, vector<1x8x16xf32>,
    } else {
    }
    return
  }
  func.func @transform_0(%arg0: i32, %arg1: i32, %arg2: i32) -> (i32, i32, i32) {
    %c0_i32 = arith.constant 0 : i32
    %c0_i32_0 = arith.constant 0 : i32
    return %arg0, %arg1, %c0_i32 : i32, i32, i32
  }
  func.func @transform_1(%arg0: i32, %arg1: i32, %arg2: i32) -> (i32, i32, i32) {
    %c0_i32 = arith.constant 0 : i32
    %c0_i32_0 = arith.constant 0 : i32
    return %arg0, %arg2, %c0_i32 : i32, i32, i32
  }
  func.func @transform_2(%arg0: i32, %arg1: i32, %arg2: i32) -> (i32, i32, i32) {
    %c0_i32 = arith.constant 0 : i32
    %c0_i32_0 = arith.constant 0 : i32
    return %arg0, %arg2, %c0_i32 : i32, i32, i32
  }
  func.func @transform_3(%arg0: i32, %arg1: i32, %arg2: i32) -> (i32, i32, i32) {
    %c0_i32 = arith.constant 0 : i32
    %c0_i32_0 = arith.constant 0 : i32
    return %arg0, %arg1, %c0_i32 : i32, i32, i32
  }
}

module attributes {stable_mosaic.version = 11 : i64} {
  func.func @kernel(%arg0: i32, %arg1: i32, %arg2: i32, %arg3: memref<16x32xf32, #tpu.memory_space<vmem>>, %arg4: memref<32x64xbf16, #tpu.memory_space<vmem>>, %arg5: memref<1x64xf32, #tpu.memory_space<vmem>>, %arg6: memref<16x64xf32, #tpu.memory_space<vmem>>, %arg7: memref<16x64xf32, #tpu.memory_space<vmem>>) attributes {dimension_semantics = [#tpu.dimension_semantics<parallel>, #tpu.dimension_semantics<parallel>, #tpu.dimension_semantics<arbitrary>], iteration_bounds = array<i64: 1, 1, 1>, scalar_prefetch = 0 : i64, scratch_operands = 1 : i64, tpu.core_type = #tpu.core_type<tc>, window_params = [{transform_indices = @transform_0, window_bounds = array<i64: 16, 32>}, {transform_indices = @transform_1, window_bounds = array<i64: 32, 64>}, {transform_indices = @transform_2, window_bounds = array<i64: 1, 64>}, {transform_indices = @transform_3, window_bounds = array<i64: 16, 64>}]} {
    %c0_i32 = arith.constant 0 : i32
    %0 = arith.cmpi eq, %arg2, %c0_i32 : i32
    %1 = arith.extui %0 : i1 to i32
    %c0_i32_0 = arith.constant 0 : i32
    %2 = arith.cmpi ne, %1, %c0_i32_0 : i32
    scf.if %2 {
      %cst_10 = arith.constant 0.000000e+00 : f32
      %13 = vector.broadcast %cst_10 : f32 to vector<16x64xf32>
      %c0_11 = arith.constant 0 : index
      %c0_12 = arith.constant 0 : index
      %14 = vector.load %arg7[%c0_11, %c0_12] : memref<16x64xf32, #tpu.memory_space<vmem>>, vector<16x64xf32>
      tpu.vector_store %arg7[%c0_11, %c0_12], %13 {strides = array<i32>} : memref<16x64xf32, #tpu.memory_space<vmem>>, vector<16x64xf32>,
    } else {
    }
    %c0 = arith.constant 0 : index
    %c0_1 = arith.constant 0 : index
    %3 = vector.load %arg7[%c0, %c0_1] : memref<16x64xf32, #tpu.memory_space<vmem>>, vector<16x64xf32>
    %c0_2 = arith.constant 0 : index
    %c0_3 = arith.constant 0 : index
    %4 = vector.load %arg3[%c0_2, %c0_3] : memref<16x32xf32, #tpu.memory_space<vmem>>, vector<16x32xf32>
    %5 = arith.truncf %4 : vector<16x32xf32> to vector<16x32xbf16>
    %c0_4 = arith.constant 0 : index
    %c0_5 = arith.constant 0 : index
    %6 = vector.load %arg4[%c0_4, %c0_5] : memref<32x64xbf16, #tpu.memory_space<vmem>>, vector<32x64xbf16>
    %cst = arith.constant dense<0.000000e+00> : vector<16x64xf32>
    %7 = tpu.matmul %5, %6, %cst {dimension_numbers = #tpu.dot_dimension_numbers<[1], [0], [0], [1], [0, 0, 1, 1], [], []>} : vector<16x32xbf16>, vector<32x64xbf16>, vector<16x64xf32> -> vector<16x64xf32>
    %8 = arith.addf %3, %7 : vector<16x64xf32>
    %c0_6 = arith.constant 0 : index
    %c0_7 = arith.constant 0 : index
    %9 = vector.load %arg7[%c0_6, %c0_7] : memref<16x64xf32, #tpu.memory_space<vmem>>, vector<16x64xf32>
    tpu.vector_store %arg7[%c0_6, %c0_7], %8 {strides = array<i32>} : memref<16x64xf32, #tpu.memory_space<vmem>>, vector<16x64xf32>,
    %c0_i32_8 = arith.constant 0 : i32
    %10 = arith.cmpi eq, %arg2, %c0_i32_8 : i32
    %11 = arith.extui %10 : i1 to i32
    %c0_i32_9 = arith.constant 0 : i32
    %12 = arith.cmpi ne, %11, %c0_i32_9 : i32
    scf.if %12 {
      %c0_10 = arith.constant 0 : index
      %c0_11 = arith.constant 0 : index
      %13 = vector.load %arg7[%c0_10, %c0_11] : memref<16x64xf32, #tpu.memory_space<vmem>>, vector<16x64xf32>
      %c0_12 = arith.constant 0 : index
      %c0_13 = arith.constant 0 : index
      %14 = vector.load %arg5[%c0_12, %c0_13] : memref<1x64xf32, #tpu.memory_space<vmem>>, vector<1x64xf32>
      %15 = vector.broadcast %14 : vector<1x64xf32> to vector<16x64xf32>
      %16 = arith.addf %13, %15 : vector<16x64xf32>
      %cst_14 = arith.constant 0.000000e+00 : f32
      %17 = vector.broadcast %cst_14 : f32 to vector<16x64xf32>
      %18 = arith.maximumf %16, %17 : vector<16x64xf32>
      %c0_15 = arith.constant 0 : index
      %c0_16 = arith.constant 0 : index
      %19 = vector.load %arg6[%c0_15, %c0_16] : memref<16x64xf32, #tpu.memory_space<vmem>>, vector<16x64xf32>
      tpu.vector_store %arg6[%c0_15, %c0_16], %18 {strides = array<i32>} : memref<16x64xf32, #tpu.memory_space<vmem>>, vector<16x64xf32>,
    } else {
    }
    return
  }
  func.func @transform_0(%arg0: i32, %arg1: i32, %arg2: i32) -> (i32, i32) {
    %c0_i32 = arith.constant 0 : i32
    return %arg0, %arg2 : i32, i32
  }
  func.func @transform_1(%arg0: i32, %arg1: i32, %arg2: i32) -> (i32, i32) {
    %c0_i32 = arith.constant 0 : i32
    return %arg2, %arg1 : i32, i32
  }
  func.func @transform_2(%arg0: i32, %arg1: i32, %arg2: i32) -> (i32, i32) {
    %c0_i32 = arith.constant 0 : i32
    %c0_i32_0 = arith.constant 0 : i32
    return %c0_i32, %arg1 : i32, i32
  }
  func.func @transform_3(%arg0: i32, %arg1: i32, %arg2: i32) -> (i32, i32) {
    %c0_i32 = arith.constant 0 : i32
    return %arg0, %arg1 : i32, i32
  }
}

module attributes {stable_mosaic.version = 11 : i64} {
  func.func @kernel(%arg0: i32, %arg1: i32, %arg2: memref<16x32xf32, #tpu.memory_space<vmem>>, %arg3: memref<32x32xbf16, #tpu.memory_space<vmem>>, %arg4: memref<1x32xf32, #tpu.memory_space<vmem>>, %arg5: memref<16x32xf32, #tpu.memory_space<vmem>>, %arg6: memref<1x32xf32, #tpu.memory_space<vmem>>, %arg7: memref<1x32xf32, #tpu.memory_space<vmem>>, %arg8: memref<16x32xf32, #tpu.memory_space<vmem>>, %arg9: memref<16x32xf32, #tpu.memory_space<vmem>>) attributes {dimension_semantics = [#tpu.dimension_semantics<parallel>, #tpu.dimension_semantics<arbitrary>], iteration_bounds = array<i64: 1, 1>, scalar_prefetch = 0 : i64, scratch_operands = 1 : i64, tpu.core_type = #tpu.core_type<tc>, window_params = [{transform_indices = @transform_0, window_bounds = array<i64: 16, 32>}, {transform_indices = @transform_1, window_bounds = array<i64: 32, 32>}, {pipeline_mode = #tpu.pipeline_mode<synchronous>, transform_indices = @transform_2, window_bounds = array<i64: 1, 32>}, {transform_indices = @transform_3, window_bounds = array<i64: 16, 32>}, {pipeline_mode = #tpu.pipeline_mode<synchronous>, transform_indices = @transform_4, window_bounds = array<i64: 1, 32>}, {pipeline_mode = #tpu.pipeline_mode<synchronous>, transform_indices = @transform_5, window_bounds = array<i64: 1, 32>}, {transform_indices = @transform_6, window_bounds = array<i64: 16, 32>}]} {
    %c0_i32 = arith.constant 0 : i32
    %0 = arith.cmpi eq, %arg1, %c0_i32 : i32
    %1 = arith.extui %0 : i1 to i32
    %c0_i32_0 = arith.constant 0 : i32
    %2 = arith.cmpi ne, %1, %c0_i32_0 : i32
    scf.if %2 {
      %cst_10 = arith.constant 0.000000e+00 : f32
      %13 = vector.broadcast %cst_10 : f32 to vector<16x32xf32>
      %c0_11 = arith.constant 0 : index
      %c0_12 = arith.constant 0 : index
      %14 = vector.load %arg9[%c0_11, %c0_12] : memref<16x32xf32, #tpu.memory_space<vmem>>, vector<16x32xf32>
      tpu.vector_store %arg9[%c0_11, %c0_12], %13 {strides = array<i32>} : memref<16x32xf32, #tpu.memory_space<vmem>>, vector<16x32xf32>,
    } else {
    }
    %c0 = arith.constant 0 : index
    %c0_1 = arith.constant 0 : index
    %3 = vector.load %arg9[%c0, %c0_1] : memref<16x32xf32, #tpu.memory_space<vmem>>, vector<16x32xf32>
    %c0_2 = arith.constant 0 : index
    %c0_3 = arith.constant 0 : index
    %4 = vector.load %arg2[%c0_2, %c0_3] : memref<16x32xf32, #tpu.memory_space<vmem>>, vector<16x32xf32>
    %5 = arith.truncf %4 : vector<16x32xf32> to vector<16x32xbf16>
    %c0_4 = arith.constant 0 : index
    %c0_5 = arith.constant 0 : index
    %6 = vector.load %arg3[%c0_4, %c0_5] : memref<32x32xbf16, #tpu.memory_space<vmem>>, vector<32x32xbf16>
    %cst = arith.constant dense<0.000000e+00> : vector<16x32xf32>
    %7 = tpu.matmul %5, %6, %cst {dimension_numbers = #tpu.dot_dimension_numbers<[1], [0], [0], [1], [0, 0, 1, 1], [], []>} : vector<16x32xbf16>, vector<32x32xbf16>, vector<16x32xf32> -> vector<16x32xf32>
    %8 = arith.addf %3, %7 : vector<16x32xf32>
    %c0_6 = arith.constant 0 : index
    %c0_7 = arith.constant 0 : index
    %9 = vector.load %arg9[%c0_6, %c0_7] : memref<16x32xf32, #tpu.memory_space<vmem>>, vector<16x32xf32>
    tpu.vector_store %arg9[%c0_6, %c0_7], %8 {strides = array<i32>} : memref<16x32xf32, #tpu.memory_space<vmem>>, vector<16x32xf32>,
    %c0_i32_8 = arith.constant 0 : i32
    %10 = arith.cmpi eq, %arg1, %c0_i32_8 : i32
    %11 = arith.extui %10 : i1 to i32
    %c0_i32_9 = arith.constant 0 : i32
    %12 = arith.cmpi ne, %11, %c0_i32_9 : i32
    scf.if %12 {
      %c0_10 = arith.constant 0 : index
      %c0_11 = arith.constant 0 : index
      %13 = vector.load %arg9[%c0_10, %c0_11] : memref<16x32xf32, #tpu.memory_space<vmem>>, vector<16x32xf32>
      %c0_12 = arith.constant 0 : index
      %c0_13 = arith.constant 0 : index
      %14 = vector.load %arg4[%c0_12, %c0_13] : memref<1x32xf32, #tpu.memory_space<vmem>>, vector<1x32xf32>
      %15 = vector.broadcast %14 : vector<1x32xf32> to vector<16x32xf32>
      %16 = arith.addf %13, %15 : vector<16x32xf32>
      %c0_14 = arith.constant 0 : index
      %c0_15 = arith.constant 0 : index
      %17 = vector.load %arg5[%c0_14, %c0_15] : memref<16x32xf32, #tpu.memory_space<vmem>>, vector<16x32xf32>
      %18 = arith.addf %16, %17 : vector<16x32xf32>
      %cst_16 = arith.constant dense<0.000000e+00> : vector<16xf32>
      %19 = vector.multi_reduction <add>, %18, %cst_16 [1] : vector<16x32xf32> to vector<16xf32>
      %20 = vector.shape_cast %19 : vector<16xf32> to vector<16x1xf32>
      %cst_17 = arith.constant 3.200000e+01 : f32
      %21 = vector.broadcast %cst_17 : f32 to vector<16x1xf32>
      %22 = arith.divf %20, %21 : vector<16x1xf32>
      %23 = vector.broadcast %22 : vector<16x1xf32> to vector<16x32xf32>
      %24 = arith.subf %18, %23 : vector<16x32xf32>
      %25 = arith.mulf %24, %24 : vector<16x32xf32>
      %cst_18 = arith.constant dense<0.000000e+00> : vector<16xf32>
      %26 = vector.multi_reduction <add>, %25, %cst_18 [1] : vector<16x32xf32> to vector<16xf32>
      %27 = vector.shape_cast %26 : vector<16xf32> to vector<16x1xf32>
      %cst_19 = arith.constant 3.200000e+01 : f32
      %28 = vector.broadcast %cst_19 : f32 to vector<16x1xf32>
      %29 = arith.divf %27, %28 : vector<16x1xf32>
      %30 = vector.broadcast %22 : vector<16x1xf32> to vector<16x32xf32>
      %31 = arith.subf %18, %30 : vector<16x32xf32>
      %cst_20 = arith.constant 9.99999974E-6 : f32
      %32 = vector.broadcast %cst_20 : f32 to vector<16x1xf32>
      %33 = arith.addf %29, %32 : vector<16x1xf32>
      %34 = math.rsqrt %33 : vector<16x1xf32>
      %35 = vector.broadcast %34 : vector<16x1xf32> to vector<16x32xf32>
      %36 = arith.mulf %31, %35 : vector<16x32xf32>
      %c0_21 = arith.constant 0 : index
      %c0_22 = arith.constant 0 : index
      %37 = vector.load %arg6[%c0_21, %c0_22] : memref<1x32xf32, #tpu.memory_space<vmem>>, vector<1x32xf32>
      %38 = vector.broadcast %37 : vector<1x32xf32> to vector<16x32xf32>
      %39 = arith.mulf %36, %38 : vector<16x32xf32>
      %c0_23 = arith.constant 0 : index
      %c0_24 = arith.constant 0 : index
      %40 = vector.load %arg7[%c0_23, %c0_24] : memref<1x32xf32, #tpu.memory_space<vmem>>, vector<1x32xf32>
      %41 = vector.broadcast %40 : vector<1x32xf32> to vector<16x32xf32>
      %42 = arith.addf %39, %41 : vector<16x32xf32>
      %c0_25 = arith.constant 0 : index
      %c0_26 = arith.constant 0 : index
      %43 = vector.load %arg8[%c0_25, %c0_26] : memref<16x32xf32, #tpu.memory_space<vmem>>, vector<16x32xf32>
      tpu.vector_store %arg8[%c0_25, %c0_26], %42 {strides = array<i32>} : memref<16x32xf32, #tpu.memory_space<vmem>>, vector<16x32xf32>,
    } else {
    }
    return
  }
  func.func @transform_0(%arg0: i32, %arg1: i32) -> (i32, i32) {
    %c0_i32 = arith.constant 0 : i32
    return %arg0, %arg1 : i32, i32
  }
  func.func @transform_1(%arg0: i32, %arg1: i32) -> (i32, i32) {
    %c0_i32 = arith.constant 0 : i32
    %c0_i32_0 = arith.constant 0 : i32
    return %arg1, %c0_i32 : i32, i32
  }
  func.func @transform_2(%arg0: i32, %arg1: i32) -> (i32, i32) {
    %c0_i32 = arith.constant 0 : i32
    %c0_i32_0 = arith.constant 0 : i32
    %c0_i32_1 = arith.constant 0 : i32
    return %c0_i32, %c0_i32_0 : i32, i32
  }
  func.func @transform_3(%arg0: i32, %arg1: i32) -> (i32, i32) {
    %c0_i32 = arith.constant 0 : i32
    %c0_i32_0 = arith.constant 0 : i32
    return %arg0, %c0_i32 : i32, i32
  }
  func.func @transform_4(%arg0: i32, %arg1: i32) -> (i32, i32) {
    %c0_i32 = arith.constant 0 : i32
    %c0_i32_0 = arith.constant 0 : i32
    %c0_i32_1 = arith.constant 0 : i32
    return %c0_i32, %c0_i32_0 : i32, i32
  }
  func.func @transform_5(%arg0: i32, %arg1: i32) -> (i32, i32) {
    %c0_i32 = arith.constant 0 : i32
    %c0_i32_0 = arith.constant 0 : i32
    %c0_i32_1 = arith.constant 0 : i32
    return %c0_i32, %c0_i32_0 : i32, i32
  }
  func.func @transform_6(%arg0: i32, %arg1: i32) -> (i32, i32) {
    %c0_i32 = arith.constant 0 : i32
    %c0_i32_0 = arith.constant 0 : i32
    return %arg0, %c0_i32 : i32, i32
  }
}

module attributes {stable_mosaic.version = 11 : i64} {
  func.func @kernel(%arg0: i32, %arg1: i32, %arg2: memref<16x64xf32, #tpu.memory_space<vmem>>, %arg3: memref<64x32xbf16, #tpu.memory_space<vmem>>, %arg4: memref<1x32xf32, #tpu.memory_space<vmem>>, %arg5: memref<16x32xf32, #tpu.memory_space<vmem>>, %arg6: memref<1x32xf32, #tpu.memory_space<vmem>>, %arg7: memref<1x32xf32, #tpu.memory_space<vmem>>, %arg8: memref<16x32xf32, #tpu.memory_space<vmem>>, %arg9: memref<16x32xf32, #tpu.memory_space<vmem>>) attributes {dimension_semantics = [#tpu.dimension_semantics<parallel>, #tpu.dimension_semantics<arbitrary>], iteration_bounds = array<i64: 1, 1>, scalar_prefetch = 0 : i64, scratch_operands = 1 : i64, tpu.core_type = #tpu.core_type<tc>, window_params = [{transform_indices = @transform_0, window_bounds = array<i64: 16, 64>}, {transform_indices = @transform_1, window_bounds = array<i64: 64, 32>}, {pipeline_mode = #tpu.pipeline_mode<synchronous>, transform_indices = @transform_2, window_bounds = array<i64: 1, 32>}, {transform_indices = @transform_3, window_bounds = array<i64: 16, 32>}, {pipeline_mode = #tpu.pipeline_mode<synchronous>, transform_indices = @transform_4, window_bounds = array<i64: 1, 32>}, {pipeline_mode = #tpu.pipeline_mode<synchronous>, transform_indices = @transform_5, window_bounds = array<i64: 1, 32>}, {transform_indices = @transform_6, window_bounds = array<i64: 16, 32>}]} {
    %c0_i32 = arith.constant 0 : i32
    %0 = arith.cmpi eq, %arg1, %c0_i32 : i32
    %1 = arith.extui %0 : i1 to i32
    %c0_i32_0 = arith.constant 0 : i32
    %2 = arith.cmpi ne, %1, %c0_i32_0 : i32
    scf.if %2 {
      %cst_10 = arith.constant 0.000000e+00 : f32
      %13 = vector.broadcast %cst_10 : f32 to vector<16x32xf32>
      %c0_11 = arith.constant 0 : index
      %c0_12 = arith.constant 0 : index
      %14 = vector.load %arg9[%c0_11, %c0_12] : memref<16x32xf32, #tpu.memory_space<vmem>>, vector<16x32xf32>
      tpu.vector_store %arg9[%c0_11, %c0_12], %13 {strides = array<i32>} : memref<16x32xf32, #tpu.memory_space<vmem>>, vector<16x32xf32>,
    } else {
    }
    %c0 = arith.constant 0 : index
    %c0_1 = arith.constant 0 : index
    %3 = vector.load %arg9[%c0, %c0_1] : memref<16x32xf32, #tpu.memory_space<vmem>>, vector<16x32xf32>
    %c0_2 = arith.constant 0 : index
    %c0_3 = arith.constant 0 : index
    %4 = vector.load %arg2[%c0_2, %c0_3] : memref<16x64xf32, #tpu.memory_space<vmem>>, vector<16x64xf32>
    %5 = arith.truncf %4 : vector<16x64xf32> to vector<16x64xbf16>
    %c0_4 = arith.constant 0 : index
    %c0_5 = arith.constant 0 : index
    %6 = vector.load %arg3[%c0_4, %c0_5] : memref<64x32xbf16, #tpu.memory_space<vmem>>, vector<64x32xbf16>
    %cst = arith.constant dense<0.000000e+00> : vector<16x32xf32>
    %7 = tpu.matmul %5, %6, %cst {dimension_numbers = #tpu.dot_dimension_numbers<[1], [0], [0], [1], [0, 0, 1, 1], [], []>} : vector<16x64xbf16>, vector<64x32xbf16>, vector<16x32xf32> -> vector<16x32xf32>
    %8 = arith.addf %3, %7 : vector<16x32xf32>
    %c0_6 = arith.constant 0 : index
    %c0_7 = arith.constant 0 : index
    %9 = vector.load %arg9[%c0_6, %c0_7] : memref<16x32xf32, #tpu.memory_space<vmem>>, vector<16x32xf32>
    tpu.vector_store %arg9[%c0_6, %c0_7], %8 {strides = array<i32>} : memref<16x32xf32, #tpu.memory_space<vmem>>, vector<16x32xf32>,
    %c0_i32_8 = arith.constant 0 : i32
    %10 = arith.cmpi eq, %arg1, %c0_i32_8 : i32
    %11 = arith.extui %10 : i1 to i32
    %c0_i32_9 = arith.constant 0 : i32
    %12 = arith.cmpi ne, %11, %c0_i32_9 : i32
    scf.if %12 {
      %c0_10 = arith.constant 0 : index
      %c0_11 = arith.constant 0 : index
      %13 = vector.load %arg9[%c0_10, %c0_11] : memref<16x32xf32, #tpu.memory_space<vmem>>, vector<16x32xf32>
      %c0_12 = arith.constant 0 : index
      %c0_13 = arith.constant 0 : index
      %14 = vector.load %arg4[%c0_12, %c0_13] : memref<1x32xf32, #tpu.memory_space<vmem>>, vector<1x32xf32>
      %15 = vector.broadcast %14 : vector<1x32xf32> to vector<16x32xf32>
      %16 = arith.addf %13, %15 : vector<16x32xf32>
      %c0_14 = arith.constant 0 : index
      %c0_15 = arith.constant 0 : index
      %17 = vector.load %arg5[%c0_14, %c0_15] : memref<16x32xf32, #tpu.memory_space<vmem>>, vector<16x32xf32>
      %18 = arith.addf %16, %17 : vector<16x32xf32>
      %cst_16 = arith.constant dense<0.000000e+00> : vector<16xf32>
      %19 = vector.multi_reduction <add>, %18, %cst_16 [1] : vector<16x32xf32> to vector<16xf32>
      %20 = vector.shape_cast %19 : vector<16xf32> to vector<16x1xf32>
      %cst_17 = arith.constant 3.200000e+01 : f32
      %21 = vector.broadcast %cst_17 : f32 to vector<16x1xf32>
      %22 = arith.divf %20, %21 : vector<16x1xf32>
      %23 = vector.broadcast %22 : vector<16x1xf32> to vector<16x32xf32>
      %24 = arith.subf %18, %23 : vector<16x32xf32>
      %25 = arith.mulf %24, %24 : vector<16x32xf32>
      %cst_18 = arith.constant dense<0.000000e+00> : vector<16xf32>
      %26 = vector.multi_reduction <add>, %25, %cst_18 [1] : vector<16x32xf32> to vector<16xf32>
      %27 = vector.shape_cast %26 : vector<16xf32> to vector<16x1xf32>
      %cst_19 = arith.constant 3.200000e+01 : f32
      %28 = vector.broadcast %cst_19 : f32 to vector<16x1xf32>
      %29 = arith.divf %27, %28 : vector<16x1xf32>
      %30 = vector.broadcast %22 : vector<16x1xf32> to vector<16x32xf32>
      %31 = arith.subf %18, %30 : vector<16x32xf32>
      %cst_20 = arith.constant 9.99999974E-6 : f32
      %32 = vector.broadcast %cst_20 : f32 to vector<16x1xf32>
      %33 = arith.addf %29, %32 : vector<16x1xf32>
      %34 = math.rsqrt %33 : vector<16x1xf32>
      %35 = vector.broadcast %34 : vector<16x1xf32> to vector<16x32xf32>
      %36 = arith.mulf %31, %35 : vector<16x32xf32>
      %c0_21 = arith.constant 0 : index
      %c0_22 = arith.constant 0 : index
      %37 = vector.load %arg6[%c0_21, %c0_22] : memref<1x32xf32, #tpu.memory_space<vmem>>, vector<1x32xf32>
      %38 = vector.broadcast %37 : vector<1x32xf32> to vector<16x32xf32>
      %39 = arith.mulf %36, %38 : vector<16x32xf32>
      %c0_23 = arith.constant 0 : index
      %c0_24 = arith.constant 0 : index
      %40 = vector.load %arg7[%c0_23, %c0_24] : memref<1x32xf32, #tpu.memory_space<vmem>>, vector<1x32xf32>
      %41 = vector.broadcast %40 : vector<1x32xf32> to vector<16x32xf32>
      %42 = arith.addf %39, %41 : vector<16x32xf32>
      %c0_25 = arith.constant 0 : index
      %c0_26 = arith.constant 0 : index
      %43 = vector.load %arg8[%c0_25, %c0_26] : memref<16x32xf32, #tpu.memory_space<vmem>>, vector<16x32xf32>
      tpu.vector_store %arg8[%c0_25, %c0_26], %42 {strides = array<i32>} : memref<16x32xf32, #tpu.memory_space<vmem>>, vector<16x32xf32>,
    } else {
    }
    return
  }
  func.func @transform_0(%arg0: i32, %arg1: i32) -> (i32, i32) {
    %c0_i32 = arith.constant 0 : i32
    return %arg0, %arg1 : i32, i32
  }
  func.func @transform_1(%arg0: i32, %arg1: i32) -> (i32, i32) {
    %c0_i32 = arith.constant 0 : i32
    %c0_i32_0 = arith.constant 0 : i32
    return %arg1, %c0_i32 : i32, i32
  }
  func.func @transform_2(%arg0: i32, %arg1: i32) -> (i32, i32) {
    %c0_i32 = arith.constant 0 : i32
    %c0_i32_0 = arith.constant 0 : i32
    %c0_i32_1 = arith.constant 0 : i32
    return %c0_i32, %c0_i32_0 : i32, i32
  }
  func.func @transform_3(%arg0: i32, %arg1: i32) -> (i32, i32) {
    %c0_i32 = arith.constant 0 : i32
    %c0_i32_0 = arith.constant 0 : i32
    return %arg0, %c0_i32 : i32, i32
  }
  func.func @transform_4(%arg0: i32, %arg1: i32) -> (i32, i32) {
    %c0_i32 = arith.constant 0 : i32
    %c0_i32_0 = arith.constant 0 : i32
    %c0_i32_1 = arith.constant 0 : i32
    return %c0_i32, %c0_i32_0 : i32, i32
  }
  func.func @transform_5(%arg0: i32, %arg1: i32) -> (i32, i32) {
    %c0_i32 = arith.constant 0 : i32
    %c0_i32_0 = arith.constant 0 : i32
    %c0_i32_1 = arith.constant 0 : i32
    return %c0_i32, %c0_i32_0 : i32, i32
  }
  func.func @transform_6(%arg0: i32, %arg1: i32) -> (i32, i32) {
    %c0_i32 = arith.constant 0 : i32
    %c0_i32_0 = arith.constant 0 : i32
    return %arg0, %c0_i32 : i32, i32
  }
}

module attributes {stable_mosaic.version = 11 : i64} {
  func.func @kernel(%arg0: i32, %arg1: i32, %arg2: i32, %arg3: memref<16x32xf32, #tpu.memory_space<vmem>>, %arg4: memref<32x50xbf16, #tpu.memory_space<vmem>>, %arg5: memref<1x50xf32, #tpu.memory_space<vmem>>, %arg6: memref<16x50xf32, #tpu.memory_space<vmem>>, %arg7: memref<16x50xf32, #tpu.memory_space<vmem>>) attributes {dimension_semantics = [#tpu.dimension_semantics<parallel>, #tpu.dimension_semantics<parallel>, #tpu.dimension_semantics<arbitrary>], iteration_bounds = array<i64: 1, 1, 1>, scalar_prefetch = 0 : i64, scratch_operands = 1 : i64, tpu.core_type = #tpu.core_type<tc>, window_params = [{transform_indices = @transform_0, window_bounds = array<i64: 16, 32>}, {transform_indices = @transform_1, window_bounds = array<i64: 32, 50>}, {transform_indices = @transform_2, window_bounds = array<i64: 1, 50>}, {transform_indices = @transform_3, window_bounds = array<i64: 16, 50>}]} {
    %c0_i32 = arith.constant 0 : i32
    %0 = arith.cmpi eq, %arg2, %c0_i32 : i32
    %1 = arith.extui %0 : i1 to i32
    %c0_i32_0 = arith.constant 0 : i32
    %2 = arith.cmpi ne, %1, %c0_i32_0 : i32
    scf.if %2 {
      %cst_10 = arith.constant 0.000000e+00 : f32
      %13 = vector.broadcast %cst_10 : f32 to vector<16x50xf32>
      %c0_11 = arith.constant 0 : index
      %c0_12 = arith.constant 0 : index
      %14 = vector.load %arg7[%c0_11, %c0_12] : memref<16x50xf32, #tpu.memory_space<vmem>>, vector<16x50xf32>
      tpu.vector_store %arg7[%c0_11, %c0_12], %13 {strides = array<i32>} : memref<16x50xf32, #tpu.memory_space<vmem>>, vector<16x50xf32>,
    } else {
    }
    %c0 = arith.constant 0 : index
    %c0_1 = arith.constant 0 : index
    %3 = vector.load %arg7[%c0, %c0_1] : memref<16x50xf32, #tpu.memory_space<vmem>>, vector<16x50xf32>
    %c0_2 = arith.constant 0 : index
    %c0_3 = arith.constant 0 : index
    %4 = vector.load %arg3[%c0_2, %c0_3] : memref<16x32xf32, #tpu.memory_space<vmem>>, vector<16x32xf32>
    %5 = arith.truncf %4 : vector<16x32xf32> to vector<16x32xbf16>
    %c0_4 = arith.constant 0 : index
    %c0_5 = arith.constant 0 : index
    %6 = vector.load %arg4[%c0_4, %c0_5] : memref<32x50xbf16, #tpu.memory_space<vmem>>, vector<32x50xbf16>
    %cst = arith.constant dense<0.000000e+00> : vector<16x50xf32>
    %7 = tpu.matmul %5, %6, %cst {dimension_numbers = #tpu.dot_dimension_numbers<[1], [0], [0], [1], [0, 0, 1, 1], [], []>} : vector<16x32xbf16>, vector<32x50xbf16>, vector<16x50xf32> -> vector<16x50xf32>
    %8 = arith.addf %3, %7 : vector<16x50xf32>
    %c0_6 = arith.constant 0 : index
    %c0_7 = arith.constant 0 : index
    %9 = vector.load %arg7[%c0_6, %c0_7] : memref<16x50xf32, #tpu.memory_space<vmem>>, vector<16x50xf32>
    tpu.vector_store %arg7[%c0_6, %c0_7], %8 {strides = array<i32>} : memref<16x50xf32, #tpu.memory_space<vmem>>, vector<16x50xf32>,
    %c0_i32_8 = arith.constant 0 : i32
    %10 = arith.cmpi eq, %arg2, %c0_i32_8 : i32
    %11 = arith.extui %10 : i1 to i32
    %c0_i32_9 = arith.constant 0 : i32
    %12 = arith.cmpi ne, %11, %c0_i32_9 : i32
    scf.if %12 {
      %c0_10 = arith.constant 0 : index
      %c0_11 = arith.constant 0 : index
      %13 = vector.load %arg7[%c0_10, %c0_11] : memref<16x50xf32, #tpu.memory_space<vmem>>, vector<16x50xf32>
      %c0_12 = arith.constant 0 : index
      %c0_13 = arith.constant 0 : index
      %14 = vector.load %arg5[%c0_12, %c0_13] : memref<1x50xf32, #tpu.memory_space<vmem>>, vector<1x50xf32>
      %15 = vector.broadcast %14 : vector<1x50xf32> to vector<16x50xf32>
      %16 = arith.addf %13, %15 : vector<16x50xf32>
      %c0_14 = arith.constant 0 : index
      %c0_15 = arith.constant 0 : index
      %17 = vector.load %arg6[%c0_14, %c0_15] : memref<16x50xf32, #tpu.memory_space<vmem>>, vector<16x50xf32>
      tpu.vector_store %arg6[%c0_14, %c0_15], %16 {strides = array<i32>} : memref<16x50xf32, #tpu.memory_space<vmem>>, vector<16x50xf32>,
    } else {
    }
    return
  }
  func.func @transform_0(%arg0: i32, %arg1: i32, %arg2: i32) -> (i32, i32) {
    %c0_i32 = arith.constant 0 : i32
    return %arg0, %arg2 : i32, i32
  }
  func.func @transform_1(%arg0: i32, %arg1: i32, %arg2: i32) -> (i32, i32) {
    %c0_i32 = arith.constant 0 : i32
    return %arg2, %arg1 : i32, i32
  }
  func.func @transform_2(%arg0: i32, %arg1: i32, %arg2: i32) -> (i32, i32) {
    %c0_i32 = arith.constant 0 : i32
    %c0_i32_0 = arith.constant 0 : i32
    return %c0_i32, %arg1 : i32, i32
  }
  func.func @transform_3(%arg0: i32, %arg1: i32, %arg2: i32) -> (i32, i32) {
    %c0_i32 = arith.constant 0 : i32
    return %arg0, %arg1 : i32, i32
  }
}

</mosaic_0001>

<bundles_post_ra>
// kernel: transformer_forward.11
= control target key start
LH: loop header
LB: loop body
LE: loop exit
PB: predicated region body
PF: predicated region fallthrough
CT: control target
= control target key end

     0   :  { %vm19_vm0 = vcmask 785408   ;;  %v132_v0 = vmov 0.0   ;;  %vm133_vm1 = vmmov 0   ;;  %vm43_vm2 = vcmask 261120   ;;  %s181_s1 = inlined_call_operand.vmem [shape: bf16[32,96], index: 1, kind: input, shape index: {}]   ;;  %s182_s0 = inlined_call_operand.vmem [shape: f32[16,32], index: 0, kind: input, shape index: {}]   ;;  %s183_s2 = inlined_call_operand.vmem [shape: f32[1,96], index: 2, kind: input, shape index: {}]   ;;  %s184_s3 = inlined_call_operand.vmem [shape: f32[16,96], index: 3, kind: output, shape index: {}]  }
   0x1   :  { %120 = vmatprep.subr.bf16.mxu0 %v132_v0  ;;  %v130_v1 = vld [vmem:[%s181_s1 + $0x8] sm:$0xff]   ;;  %124 = vmatprep.mubr.msk.bf16.mxu0 %vm133_vm1, %v132_v0  ;;  %20 = vst.msk [vmem:[#allocation2] sm:$0xff] %vm19_vm0, %v132_v0  ;;  %21 = vst.msk [vmem:[#allocation2 + $0x8] sm:$0xff] %vm19_vm0, %v132_v0  ;;  %v131_v2 = vld [vmem:[%s181_s1] sm:$0xff]  }
   0x2   :  { %121 = vmatpush3.bf16.msra.mxu0 %v130_v1  ;;  %v24_v3 = vld [vmem:[%s182_s0] sm:$0xff]  ;;  %v25_v4 = vld [vmem:[%s182_s0 + $0x8] sm:$0xff] }
   0x3   :  { %122 = vmatprep.subr.bf16.mxu0 %v132_v0  ;;  %v26_v5 = vpack.c.bf16 %v25_v4, %v24_v3  ;;  %v116_v14 = vld [vmem:[%s183_s2] ss:$0 sm:$0xff] }
   0x6   :  { %123 = vmatpush3.bf16.msra.mxu0 %v131_v2 }
   0x8   :  { %v22_v6 = vld [vmem:[#allocation2] sm:$0xff]  ;;  %v23_v10 = vld [vmem:[#allocation2 + $0x8] sm:$0xff] }
   0x9   :  { %125 = vmatmul.mubr.msk.bf16.vlgmr.msra.gmra.mxu0 %vm43_vm2, %v26_v5 }
  0xc9   :  { %v81_v7 = vpop.f32.mrf.mxu0 }
  0xca   :  { %v88_v8 = vadd.f32 %v81_v7, %v22_v6 }
  0xcb   :  { %v126_v9 = vpop.f32.mrf.mxu0 }
  0xcc   :  { %91 = vst.msk [vmem:[#allocation2] sm:$0xff] %vm19_vm0, %v88_v8 }
  0xcd   :  { %v84_v11 = vpop.f32.mrf.mxu0 }
  0xce   :  { %v89_v12 = vadd.f32 %v84_v11, %v23_v10 }
  0xcf   :  { %v127_v13 = vpop.f32.mrf.mxu0 }
  0xd0   :  { %92 = vst.msk [vmem:[#allocation2 + $0x8] sm:$0xff] %vm19_vm0, %v89_v12 }
  0xd3   :  { %v96_v15 = vld [vmem:[#allocation2] sm:$0xff] }
  0xd4   :  { %v105_v16 = vadd.f32 %v116_v14, %v96_v15 }
  0xd6   :  { %107 = vst.msk [vmem:[%s184_s3] sm:$0xff] %vm19_vm0, %v105_v16 }
  0xd7   :  { %v97_v17 = vld [vmem:[#allocation2 + $0x8] sm:$0xff] }
  0xd8   :  { %v106_v18 = vadd.f32 %v116_v14, %v97_v17 }
  0xda   :  { %108 = vst.msk [vmem:[%s184_s3 + $0x8] sm:$0xff] %vm19_vm0, %v106_v18 }

// kernel: transformer_forward.14
= control target key start
LH: loop header
LB: loop body
LE: loop exit
PB: predicated region body
PF: predicated region fallthrough
CT: control target
= control target key end

     0   :  { %vm19_vm0 = vcmask 523264   ;;  %v134_v0 = vmov 0.0   ;;  %vm135_vm1 = vmmov 0   ;;  %vm43_vm2 = vcmask 261120   ;;  %s183_s1 = inlined_call_operand.vmem [shape: bf16[32,64], index: 1, kind: input, shape index: {}]   ;;  %s184_s0 = inlined_call_operand.vmem [shape: f32[16,32], index: 0, kind: input, shape index: {}]   ;;  %s185_s2 = inlined_call_operand.vmem [shape: f32[1,64], index: 2, kind: input, shape index: {}]   ;;  %s186_s3 = inlined_call_operand.vmem [shape: f32[16,64], index: 3, kind: output, shape index: {}]  }
   0x1   :  { %122 = vmatprep.subr.bf16.mxu0 %v134_v0  ;;  %v132_v1 = vld [vmem:[%s183_s1 + $0x8] sm:$0xff]   ;;  %126 = vmatprep.mubr.msk.bf16.mxu0 %vm135_vm1, %v134_v0  ;;  %20 = vst.msk [vmem:[#allocation2] sm:$0xff] %vm19_vm0, %v134_v0  ;;  %21 = vst.msk [vmem:[#allocation2 + $0x8] sm:$0xff] %vm19_vm0, %v134_v0  ;;  %v133_v2 = vld [vmem:[%s183_s1] sm:$0xff]  }
   0x2   :  { %123 = vmatpush3.bf16.msra.mxu0 %v132_v1  ;;  %v24_v3 = vld [vmem:[%s184_s0] sm:$0xff]  ;;  %v25_v4 = vld [vmem:[%s184_s0 + $0x8] sm:$0xff] }
   0x3   :  { %124 = vmatprep.subr.bf16.mxu0 %v134_v0  ;;  %v26_v5 = vpack.c.bf16 %v25_v4, %v24_v3  ;;  %v118_v14 = vld [vmem:[%s185_s2] ss:$0 sm:$0xff] }
   0x6   :  { %125 = vmatpush3.bf16.msra.mxu0 %v133_v2 }
   0x8   :  { %v22_v6 = vld [vmem:[#allocation2] sm:$0xff]  ;;  %v23_v10 = vld [vmem:[#allocation2 + $0x8] sm:$0xff] }
   0x9   :  { %127 = vmatmul.mubr.msk.bf16.vlgmr.msra.gmra.mxu0 %vm43_vm2, %v26_v5 }
  0xc9   :  { %v81_v7 = vpop.f32.mrf.mxu0 }
  0xca   :  { %v88_v8 = vadd.f32 %v81_v7, %v22_v6 }
  0xcb   :  { %v128_v9 = vpop.f32.mrf.mxu0 }
  0xcc   :  { %91 = vst.msk [vmem:[#allocation2] sm:$0xff] %vm19_vm0, %v88_v8 }
  0xcd   :  { %v84_v11 = vpop.f32.mrf.mxu0 }
  0xce   :  { %v89_v12 = vadd.f32 %v84_v11, %v23_v10 }
  0xcf   :  { %v129_v13 = vpop.f32.mrf.mxu0 }
  0xd0   :  { %92 = vst.msk [vmem:[#allocation2 + $0x8] sm:$0xff] %vm19_vm0, %v89_v12 }
  0xd3   :  { %v96_v15 = vld [vmem:[#allocation2] sm:$0xff] }
  0xd4   :  { %v105_v16 = vadd.f32 %v118_v14, %v96_v15 }
  0xd6   :  { %v107_v17 = vmax.f32 %v105_v16, 0.0 }
  0xd7   :  { %v97_v18 = vld [vmem:[#allocation2 + $0x8] sm:$0xff] }
  0xd8   :  { %109 = vst.msk [vmem:[%s186_s3] sm:$0xff] %vm19_vm0, %v107_v17  ;;  %v106_v19 = vadd.f32 %v118_v14, %v97_v18 }
  0xda   :  { %v108_v20 = vmax.f32 %v106_v19, 0.0 }
  0xdc   :  { %110 = vst.msk [vmem:[%s186_s3 + $0x8] sm:$0xff] %vm19_vm0, %v108_v20 }

// kernel: transformer_forward.12
= control target key start
LH: loop header
LB: loop body
LE: loop exit
PB: predicated region body
PF: predicated region fallthrough
CT: control target
= control target key end

     0   :  { %s658_s12 = smov 0   ;;  %s660_s13 = smov 0   ;;  %s715_s0 = inlined_call_operand.vmem [shape: f32[4,8,16], index: 0, kind: input, shape index: {}]   ;;  %s716_s1 = inlined_call_operand.vmem [shape: f32[4,8,16], index: 1, kind: input, shape index: {}]   ;;  %s717_s2 = inlined_call_operand.vmem [shape: f32[4,8,16], index: 2, kind: input, shape index: {}]   ;;  %s718_s3 = inlined_call_operand.vmem [shape: f32[4,8,16], index: 3, kind: output, shape index: {}]  }
   0x1   :  { %s662_s14 = smov 0  }
   0x2 LB: > { %s32_s15 = sadd.s32 1, %s628_s13  ;;  %p549_p0 = scmp.ge.s32.totalorder %s632_s14, 1  ;;  %s632_s14 = sphi %s662_s14, %s13_s14   ;;  %s628_s13 = sphi %s660_s13, %s720_s13   ;;  %s624_s12 = sphi %s658_s12, %s719_s12  }
   0x3   : > { %p34_p1 = scmp.ge.s32.totalorder %s32_s15, 4  ;;  %p190_p2 = scmp.lt.s32.totalorder %s632_s14, 5 }
   0x5   : > { %s722_s15 = smov (%p34_p1, %s32_s15), 0  ;;  %p191_p3 = pnand %p549_p0, %p190_p2 }
   0x6   : > { %p232_p4 = scmp.lt.s32.totalorder (!%p191_p3), %s624_s12, 3 }
   0x7   : > { %194 = sbr.rel (%p191_p3) target bundleno = 795 (0x31b), region = 32 }
   0xc   : > { %vm268_vm0 = vcmask 130048   ;;  %v634_v0 = vmov 0.0   ;;  %vm635_vm1 = vmmov 0   ;;  %s724_s12 = smov (!%p232_p4, %s624_s12), 3  ;;  %vm265_vm2 = vcmask 7168  }
   0xd   : > { %562 = vmatprep.subr.bf16.mxu0 %v634_v0  ;;  %269 = vst.msk [vmem:[#allocation4] sm:$0xff] %vm268_vm0, %v634_v0  ;;  %564 = vmatprep.mubr.msk.bf16.mxu0 %vm635_vm1, %v634_v0  ;;  %s677_s16 = sshll.u32 %s724_s12, 3  ;;  %v636_v6 = vmov -1e+30   ;;  %v329_v7 = vlaneseq  ;;  %vm340_vm4 = vcmask 64512   ;;  %v637_v17 = vmov 0  }
   0xe   : > { %568 = vmatprep.subr.bf16.mxu1 %v634_v0  ;;  %570 = vmatprep.mubr.msk.bf16.mxu1 %vm635_vm1, %v634_v0  ;;  %s245_s19 = scalar_lea.vmem %s716_s1, %s677_s16  ;;  %s238_s22 = scalar_lea.vmem %s715_s0, %s677_s16  ;;  %266 = vst.msk [vmem:[#allocation2] sm:$0xff] %vm265_vm2, %v636_v6  ;;  %267 = vst.msk [vmem:[#allocation3] sm:$0xff] %vm265_vm2, %v634_v0  ;;  %vm377_vm5 = vcmask 1043456  }
   0xf   : > { %v279_v1 = vld [vmem:[%s245_s19] sm:$0xff]  ;;  %v330_v8 = vshrl.u32 %v329_v7, 7  ;;  %v334_v9 = vand.u32 127, %v329_v7  ;;  %602 = vset.pattern.permute.xlu0 %v637_v17  ;;  %603 = vset.pattern.permute.xlu1 %v637_v17  ;;  %s252_s25 = scalar_lea.vmem %s717_s2, %s677_s16  ;;  %s259_s28 = scalar_lea.vmem %s718_s3, %s677_s16 }
  0x10   : > { %v280_v2 = vpack.c.bf16 %v279_v1, %v279_v1  ;;  %v277_v4 = vld [vmem:[%s238_s22] sm:$0xff] }
  0x11   : > { %v278_v5 = vpack.c.bf16 %v277_v4, %v277_v4  ;;  %vm337_vm3 = vcmp.le.s32.totalorder %v334_v9, %v330_v8  ;;  %v372_v22 = vld [vmem:[%s252_s25] sm:$0xff] }
  0x12   : > { %v286_v3 = vsel %vm268_vm0, %v280_v2, 0  ;;  %v373_v23 = vpack.c.bf16 %v372_v22, %v372_v22 }
  0x13   : > { %563 = vmatpush3.bf16.xpose.msra.mxu0 %v286_v3 }
  0x14   : > { %v379_v24 = vsel %vm377_vm5, %v373_v23, 0  ;;  %v364_v39 = vld [vmem:[#allocation4] sm:$0xff] }
  0x15   : > { %v339_v18 = vld [vmem:[#allocation2] sm:$0xff]  ;;  %569 = vmatpush3.bf16.msra.mxu1 %v379_v24  ;;  %v356_v33 = vld [vmem:[#allocation3] sm:$0xff] }
  0x1a   : > { %565 = vmatmul.mubr.msk.bf16.vlgmr.msra.gmra.mxu0 %vm268_vm0, %v278_v5 }
  0xda   : > { %v322_v10 = vpop.f32.mrf.mxu0 }
  0xdb   : > { %v328_v11 = vmul.f32 0.25, %v322_v10 }
  0xdc   : > { %v566_v12 = vpop.f32.mrf.mxu0 }
  0xdd   : > { %v338_v13 = vsel %vm337_vm3, %v328_v11, -1e+30 }
  0xde   : > { %v325_v14 = vpop.f32.mrf.mxu0  ;;  %v341_v15 = vsel %vm340_vm4, %v338_v13, -inf }
  0xdf   : > { %342 = vmax.xlane.f32.xlu0 %v341_v15 }
  0xe0   : > { %v567_v16 = vpop.f32.mrf.mxu0 }
 0x168   : > { %v343_v19 = vpop.xlane.xlu0 %342 }
 0x169   : > { %v344_v20 = vmax.f32 %v339_v18, %v343_v19 }
 0x16b   : > { %v345_v21 = vsub.f32 %v339_v18, %v344_v20  ;;  %423 = vst.msk [vmem:[#allocation2] sm:$0xff] %vm265_vm2, %v344_v20  ;;  %350 = vperm.xlu0 %602, %v344_v20  }
 0x16d   : > { %v346_v29 = vmul.f32 1.442695, %v345_v21 }
 0x1e6   : > { %v351_v25 = vpop.permute.xlu0 %350 }
 0x1e7   : > { %v353_v26 = vsub.f32 %v338_v13, %v351_v25 }
 0x1e9   : > { %v354_v27 = vmul.f32 1.442695, %v353_v26 }
 0x1eb   : > { %604 = vpow2.f32 %v354_v27 }
 0x1ec   : > { %606 = vpow2.f32 %v346_v29 }
 0x1f8   : > { %v605_v28 = vpop.eup %604 }
 0x1f9   : > { %v358_v30 = vsel %vm340_vm4, %v605_v28, 0.0  ;;  %v371_v31 = vpack.c.bf16 %v605_v28, %v605_v28  ;;  %v607_v32 = vpop.eup %606 }
 0x1fa   : > { %359 = vadd.xlane.f32.xlu1 %v358_v30  ;;  %v357_v34 = vmul.f32 %v607_v32, %v356_v33 }
 0x1fb   : > { %571 = vmatmul.mubr.msk.bf16.vlgmr.msra.gmra.mxu1 %vm340_vm4, %v371_v31 }
 0x20b   : > { %367 = vperm.xlu1 %603, %v607_v32  }
 0x283   : > { %v360_v35 = vpop.xlane.xlu1 %359 }
 0x284   : > { %v361_v36 = vadd.f32 %v360_v35, %v357_v34 }
 0x286   : > { %363 = vst.msk [vmem:[#allocation3] sm:$0xff] %vm265_vm2, %v361_v36 }
 0x287   : > { %v368_v40 = vpop.permute.xlu1 %367 }
 0x288   : > { %v370_v41 = vmul.f32 %v368_v40, %v364_v39 }
 0x28d   : > { %v428_v37 = vld [vmem:[#allocation3] sm:$0xff] }
 0x28e   : > { %608 = vrcp.f32 %v428_v37 }
 0x29b   : > { %v609_v38 = vpop.eup %608 }
 0x29c   : > { %432 = vperm.xlu1 %603, %v609_v38  }
 0x2bb   : > { %v415_v42 = vpop.f32.mrf.mxu1 }
 0x2bc   : > { %v421_v43 = vadd.f32 %v415_v42, %v370_v41 }
 0x2bd   : > { %v572_v44 = vpop.f32.mrf.mxu1 }
 0x2be   : > { %422 = vst.msk [vmem:[#allocation4] sm:$0xff] %vm268_vm0, %v421_v43 }
 0x2bf   : > { %v418_v45 = vpop.f32.mrf.mxu1 }
 0x2c1   : > { %v573_v46 = vpop.f32.mrf.mxu1 }
 0x2c5   : > { %v427_v47 = vld [vmem:[#allocation4] sm:$0xff] }
 0x317   : > { %v433_v48 = vpop.permute.xlu1 %432 }
 0x318   : > { %v435_v49 = vmul.f32 %v433_v48, %v427_v47 }
 0x31a   : > { %437 = vst.msk [vmem:[%s259_s28] sm:$0xff] %vm268_vm0, %v435_v49 }
 0x31b PF: > { %s13_s14 = sadd.s32 1, %s632_s14   ;;  %s719_s12 = smov %s628_s13 }
 0x31c   : > { %p10_p5 = scmp.ge.s32.totalorder %s13_s14, 6   ;;  %s720_s13 = smov %s722_s15 }
 0x31e   :  { %12 = sbr.rel (!%p10_p5) target bundleno = 2 (0x2), region = 80 }

// kernel: transformer_forward.13
= control target key start
LH: loop header
LB: loop body
LE: loop exit
PB: predicated region body
PF: predicated region fallthrough
CT: control target
= control target key end

     0   :  { %vm28_vm0 = vcmask 261120   ;;  %v195_v0 = vmov 0.0   ;;  %vm196_vm1 = vmmov 0   ;;  %s276_s1 = inlined_call_operand.vmem [shape: bf16[32,32], index: 1, kind: input, shape index: {}]   ;;  %s277_s0 = inlined_call_operand.vmem [shape: f32[16,32], index: 0, kind: input, shape index: {}]   ;;  %s278_s2 = inlined_call_operand.vmem [shape: f32[1,32], index: 2, kind: input, shape index: {}]   ;;  %s279_s3 = inlined_call_operand.vmem [shape: f32[16,32], index: 3, kind: input, shape index: {}]   ;;  %s280_s4 = inlined_call_operand.vmem [shape: f32[1,32], index: 4, kind: input, shape index: {}]   ;;  %s281_s5 = inlined_call_operand.vmem [shape: f32[1,32], index: 5, kind: input, shape index: {}]   ;;  %s282_s6 = inlined_call_operand.vmem [shape: f32[16,32], index: 6, kind: output, shape index: {}]  }
   0x1   :  { %179 = vmatprep.subr.bf16.mxu0 %v195_v0  ;;  %v189_v1 = vld [vmem:[%s276_s1 + $0x8] sm:$0xff]   ;;  %183 = vmatprep.mubr.msk.bf16.mxu0 %vm196_vm1, %v195_v0  ;;  %29 = vst.msk [vmem:[#allocation2] sm:$0xff] %vm28_vm0, %v195_v0  ;;  %30 = vst.msk [vmem:[#allocation2 + $0x8] sm:$0xff] %vm28_vm0, %v195_v0  ;;  %v190_v2 = vld [vmem:[%s276_s1] sm:$0xff]  }
   0x2   :  { %180 = vmatpush3.bf16.msra.mxu0 %v189_v1  ;;  %v33_v3 = vld [vmem:[%s277_s0] sm:$0xff]  ;;  %v34_v4 = vld [vmem:[%s277_s0 + $0x8] sm:$0xff] }
   0x3   :  { %181 = vmatprep.subr.bf16.mxu0 %v195_v0  ;;  %v35_v5 = vpack.c.bf16 %v34_v4, %v33_v3  ;;  %v173_v14 = vld [vmem:[%s278_s2] ss:$0 sm:$0xff]  ;;  %v116_v20 = vld [vmem:[%s279_s3 + $0x8] sm:$0xff] }
   0x4   :  { %v115_v16 = vld [vmem:[%s279_s3] sm:$0xff] }
   0x5   :  { %v174_v42 = vld [vmem:[%s280_s4] ss:$0 sm:$0xff] }
   0x6   :  { %182 = vmatpush3.bf16.msra.mxu0 %v190_v2  ;;  %v175_v44 = vld [vmem:[%s281_s5] ss:$0 sm:$0xff] }
   0x8   :  { %v31_v6 = vld [vmem:[#allocation2] sm:$0xff]  ;;  %v32_v10 = vld [vmem:[#allocation2 + $0x8] sm:$0xff] }
   0x9   :  { %184 = vmatmul.mubr.msk.bf16.vlgmr.msra.gmra.mxu0 %vm28_vm0, %v35_v5 }
  0xc9   :  { %v90_v7 = vpop.f32.mrf.mxu0 }
  0xca   :  { %v97_v8 = vadd.f32 %v90_v7, %v31_v6 }
  0xcb   :  { %v185_v9 = vpop.f32.mrf.mxu0 }
  0xcc   :  { %99 = vst.msk [vmem:[#allocation2] sm:$0xff] %vm28_vm0, %v97_v8 }
  0xcd   :  { %v93_v11 = vpop.f32.mrf.mxu0 }
  0xce   :  { %v98_v12 = vadd.f32 %v93_v11, %v32_v10 }
  0xcf   :  { %v186_v13 = vpop.f32.mrf.mxu0 }
  0xd0   :  { %100 = vst.msk [vmem:[#allocation2 + $0x8] sm:$0xff] %vm28_vm0, %v98_v12 }
  0xd3   :  { %v104_v15 = vld [vmem:[#allocation2] sm:$0xff] }
  0xd4   :  { %v113_v17 = vadd.f32 %v173_v14, %v104_v15 }
  0xd6   :  { %v117_v18 = vadd.f32 %v115_v16, %v113_v17 }
  0xd7   :  { %v105_v19 = vld [vmem:[#allocation2 + $0x8] sm:$0xff] }
  0xd8   :  { %v119_v21 = vsel %vm28_vm0, %v117_v18, 0.0  ;;  %v114_v22 = vadd.f32 %v173_v14, %v105_v19 }
  0xd9   :  { %120 = vadd.xlane.f32.xlu0 %v119_v21 }
  0xda   :  { %v118_v23 = vadd.f32 %v116_v20, %v114_v22 }
  0xdc   :  { %v122_v24 = vsel %vm28_vm0, %v118_v23, 0.0 }
  0xdd   :  { %123 = vadd.xlane.f32.xlu0 %v122_v24 }
 0x162   :  { %v121_v25 = vpop.xlane.xlu0 %120 }
 0x163   :  { %v126_v26 = vmul.f32 0.03125, %v121_v25 }
 0x165   :  { %v128_v27 = vsub.f32 %v117_v18, %v126_v26 }
 0x166   :  { %v124_v28 = vpop.xlane.xlu0 %123 }
 0x167   :  { %v127_v29 = vmul.f32 0.03125, %v124_v28  ;;  %v130_v30 = vmul.f32 %v128_v27, %v128_v27 }
 0x169   :  { %v129_v31 = vsub.f32 %v118_v23, %v127_v29  ;;  %v132_v32 = vsel %vm28_vm0, %v130_v30, 0.0 }
 0x16a   :  { %133 = vadd.xlane.f32.xlu1 %v132_v32 }
 0x16b   :  { %v131_v33 = vmul.f32 %v129_v31, %v129_v31 }
 0x16d   :  { %v135_v34 = vsel %vm28_vm0, %v131_v33, 0.0 }
 0x16e   :  { %136 = vadd.xlane.f32.xlu1 %v135_v34 }
 0x1f3   :  { %v134_v35 = vpop.xlane.xlu1 %133 }
 0x1f4   :  { %v138_v36 = vmul.f32 0.03125, %v134_v35 }
 0x1f6   :  { %v140_v37 = vadd.f32 1e-05, %v138_v36 }
 0x1f7   :  { %v137_v38 = vpop.xlane.xlu1 %136 }
 0x1f8   :  { %191 = vrsqrt.f32 %v140_v37  ;;  %v139_v39 = vmul.f32 0.03125, %v137_v38 }
 0x1fa   :  { %v141_v40 = vadd.f32 1e-05, %v139_v39 }
 0x1fc   :  { %193 = vrsqrt.f32 %v141_v40 }
 0x205   :  { %v192_v41 = vpop.eup %191 }
 0x206   :  { %v144_v43 = vmul.f32 %v192_v41, %v128_v27 }
 0x208   :  { %v153_v45 = vmul.f32 %v174_v42, %v144_v43 }
 0x209   :  { %v194_v46 = vpop.eup %193 }
 0x20a   :  { %v162_v47 = vadd.f32 %v175_v44, %v153_v45  ;;  %v145_v48 = vmul.f32 %v194_v46, %v129_v31 }
 0x20c   :  { %164 = vst.msk [vmem:[%s282_s6] sm:$0xff] %vm28_vm0, %v162_v47  ;;  %v154_v49 = vmul.f32 %v174_v42, %v145_v48 }
 0x20e   :  { %v163_v50 = vadd.f32 %v175_v44, %v154_v49 }
 0x210   :  { %165 = vst.msk [vmem:[%s282_s6 + $0x8] sm:$0xff] %vm28_vm0, %v163_v50 }

// kernel: transformer_forward.21
= control target key start
LH: loop header
LB: loop body
LE: loop exit
PB: predicated region body
PF: predicated region fallthrough
CT: control target
= control target key end

     0   :  { %v170_v1 = vmov 0.0   ;;  %vm171_vm0 = vmmov 0   ;;  %vm20_vm1 = vcmask 408576   ;;  %s219_s0 = inlined_call_operand.vmem [shape: f32[16,32], index: 0, kind: input, shape index: {}]   ;;  %s220_s1 = inlined_call_operand.vmem [shape: bf16[32,50], index: 1, kind: input, shape index: {}]   ;;  %s221_s2 = inlined_call_operand.vmem [shape: f32[1,50], index: 2, kind: input, shape index: {}]   ;;  %s222_s3 = inlined_call_operand.hbm [shape: f32[16,50], index: 3, kind: output, shape index: {}]  }
   0x1   :  { %v146_v0 = vld [vmem:[%s220_s1 + $0x8] sm:$0xff]   ;;  %133 = vmatprep.subr.bf16.mxu0 %v170_v1  ;;  %v147_v2 = vld [vmem:[%s220_s1] sm:$0xff]   ;;  %137 = vmatprep.mubr.msk.bf16.mxu0 %vm171_vm0, %v170_v1 }
   0x2   :  { %134 = vmatpush3.bf16.msra.mxu0 %v146_v0  ;;  %v25_v3 = vld [vmem:[%s219_s0] sm:$0xff]  ;;  %v26_v4 = vld [vmem:[%s219_s0 + $0x8] sm:$0xff] }
   0x3   :  { %8 = vsyncpa [#allocation4], 0  ;;  %135 = vmatprep.subr.bf16.mxu0 %v170_v1  ;;  %21 = vst.msk [vmem:[#allocation2] sm:$0xff] %vm20_vm1, %v170_v1  ;;  %v27_v5 = vpack.c.bf16 %v26_v4, %v25_v3  ;;  %vm44_vm2 = vcmask 261120   ;;  %v129_v14 = vld [vmem:[%s221_s2] ss:$0 sm:$0xff] }
   0x4   :  { %22 = vst.msk [vmem:[#allocation2 + $0x8] sm:$0xff] %vm20_vm1, %v170_v1  ;;  %s172_s20 = smov [#allocation3]  }
   0x5   :  { %s115_s21 = sshll.u32 %s172_s20, 4  ;;  %s116_s21 = int_to_ptr.vmem [resolvable:$true] %s115_s21 }
   0x6   :  { %136 = vmatpush3.bf16.msra.mxu0 %v147_v2  ;;  %s148_s22 = scalar_lea.vmem %s116_s21, 256  ;;  %p153_p1 = scmp.lt.s32.totalorder %s116_s21, %s116_s21 }
   0x7   :  { %p149_p0 = scmp.ne.s32.totalorder %s116_s21, %s148_s22  ;;  %p154_p2 = scmp.lt.s32.totalorder %s148_s22, %s148_s22 }
   0x9   :  { %138 = vmatmul.mubr.msk.bf16.vlgmr.msra.gmra.mxu0 %vm44_vm2, %v27_v5  ;;  %p155_p3 = por %p154_p2, %p153_p1 }
   0xa   :  { %v23_v6 = vld [vmem:[#allocation2] sm:$0xff] }
   0xb   :  { %v24_v10 = vld [vmem:[#allocation2 + $0x8] sm:$0xff]  ;;  %p156_p4 = pnand %p155_p3, %p149_p0 }
  0xc9   :  { %v82_v7 = vpop.f32.mrf.mxu0 }
  0xca   :  { %v89_v8 = vadd.f32 %v82_v7, %v23_v6 }
  0xcb   :  { %v139_v9 = vpop.f32.mrf.mxu0 }
  0xcc   :  { %92 = vst.msk [vmem:[#allocation2] sm:$0xff] %vm20_vm1, %v89_v8 }
  0xcd   :  { %v85_v11 = vpop.f32.mrf.mxu0 }
  0xce   :  { %v90_v12 = vadd.f32 %v85_v11, %v24_v10 }
  0xcf   :  { %v140_v13 = vpop.f32.mrf.mxu0 }
  0xd0   :  { %93 = vst.msk [vmem:[#allocation2 + $0x8] sm:$0xff] %vm20_vm1, %v90_v12 }
  0xd3   :  { %v97_v15 = vld [vmem:[#allocation2] sm:$0xff] }
  0xd4   :  { %v106_v16 = vadd.f32 %v129_v14, %v97_v15 }
  0xd6   :  { %108 = vst.msk [vmem:[#allocation3] sm:$0xff] %vm20_vm1, %v106_v16 }
  0xd7   :  { %v98_v17 = vld [vmem:[#allocation2 + $0x8] sm:$0xff] }
  0xd8   :  { %v107_v18 = vadd.f32 %v129_v14, %v98_v17 }
  0xda   :  { %109 = vst.msk [vmem:[#allocation3 + $0x8] sm:$0xff] %vm20_vm1, %v107_v18 }
  0xdb   :  { %159 = shalt.err (!%p156_p4)
}
  0xdc   :  { %s173_s23 = smov 128   ;;  %s174_s2 = smov 8  }
  0xdd   :  { %121 = dma.vmem_to_hbm [thread:$0]  %s116_s21, 256, %s222_s3, [#allocation4], %s173_s23, %s173_s23, %s174_s2  }
  0xde   :  { %168 = dma.done.wait [#allocation4], 256  }
  0xdf   :  { %169 = vsyncadd [#allocation4], 4294967040 }
  0xe0   :  { %125 = vsyncpa [#allocation4], 1 }

// kernel: transformer_forward.15
= control target key start
LH: loop header
LB: loop body
LE: loop exit
PB: predicated region body
PF: predicated region fallthrough
CT: control target
= control target key end

     0   :  { %vm28_vm0 = vcmask 261120   ;;  %v222_v0 = vmov 0.0   ;;  %vm223_vm1 = vmmov 0   ;;  %vm68_vm2 = vcmask 523264   ;;  %s308_s1 = inlined_call_operand.vmem [shape: bf16[64,32], index: 1, kind: input, shape index: {}]   ;;  %s309_s0 = inlined_call_operand.vmem [shape: f32[16,64], index: 0, kind: input, shape index: {}]   ;;  %s310_s2 = inlined_call_operand.vmem [shape: f32[1,32], index: 2, kind: input, shape index: {}]   ;;  %s311_s3 = inlined_call_operand.vmem [shape: f32[16,32], index: 3, kind: input, shape index: {}]   ;;  %s312_s4 = inlined_call_operand.vmem [shape: f32[1,32], index: 4, kind: input, shape index: {}]   ;;  %s313_s5 = inlined_call_operand.vmem [shape: f32[1,32], index: 5, kind: input, shape index: {}]   ;;  %s314_s6 = inlined_call_operand.vmem [shape: f32[16,32], index: 6, kind: output, shape index: {}]  }
   0x1   :  { %200 = vmatprep.subr.bf16.mxu0 %v222_v0  ;;  %v214_v1 = vld [vmem:[%s308_s1 + $0x18] sm:$0xff]   ;;  %208 = vmatprep.mubr.msk.bf16.mxu0 %vm223_vm1, %v222_v0  ;;  %29 = vst.msk [vmem:[#allocation2] sm:$0xff] %vm28_vm0, %v222_v0  ;;  %30 = vst.msk [vmem:[#allocation2 + $0x8] sm:$0xff] %vm28_vm0, %v222_v0  ;;  %v215_v2 = vld [vmem:[%s308_s1 + $0x10] sm:$0xff]  }
   0x2   :  { %201 = vmatpush3.bf16.msra.mxu0 %v214_v1  ;;  %v216_v3 = vld [vmem:[%s308_s1 + $0x8] sm:$0xff]   ;;  %v217_v4 = vld [vmem:[%s308_s1] sm:$0xff]  }
   0x3   :  { %202 = vmatprep.subr.bf16.mxu0 %v222_v0  ;;  %v33_v5 = vld [vmem:[%s309_s0] sm:$0xff]  ;;  %v34_v6 = vld [vmem:[%s309_s0 + $0x8] sm:$0xff] }
   0x4   :  { %v35_v7 = vpack.c.bf16 %v34_v6, %v33_v5  ;;  %v192_v16 = vld [vmem:[%s310_s2] ss:$0 sm:$0xff]  ;;  %v133_v22 = vld [vmem:[%s311_s3 + $0x8] sm:$0xff] }
   0x5   :  { %v132_v18 = vld [vmem:[%s311_s3] sm:$0xff] }
   0x6   :  { %203 = vmatpush3.bf16.msra.mxu0 %v215_v2  ;;  %v193_v44 = vld [vmem:[%s312_s4] ss:$0 sm:$0xff] }
   0x7   :  { %204 = vmatprep.subr.bf16.mxu0 %v222_v0  ;;  %v194_v46 = vld [vmem:[%s313_s5] ss:$0 sm:$0xff] }
   0x8   :  { %v31_v8 = vld [vmem:[#allocation2] sm:$0xff]  ;;  %v32_v12 = vld [vmem:[#allocation2 + $0x8] sm:$0xff] }
   0xa   :  { %205 = vmatpush3.bf16.msra.mxu0 %v216_v3 }
   0xb   :  { %206 = vmatprep.subr.bf16.mxu0 %v222_v0 }
   0xe   :  { %207 = vmatpush3.bf16.msra.mxu0 %v217_v4 }
  0x11   :  { %209 = vmatmul.mubr.msk.bf16.vlgmr.msra.gmra.mxu0 %vm68_vm2, %v35_v7 }
  0xd1   :  { %v106_v9 = vpop.f32.mrf.mxu0 }
  0xd2   :  { %v113_v10 = vadd.f32 %v106_v9, %v31_v8 }
  0xd3   :  { %v210_v11 = vpop.f32.mrf.mxu0 }
  0xd4   :  { %116 = vst.msk [vmem:[#allocation2] sm:$0xff] %vm28_vm0, %v113_v10 }
  0xd5   :  { %v109_v13 = vpop.f32.mrf.mxu0 }
  0xd6   :  { %v114_v14 = vadd.f32 %v109_v13, %v32_v12 }
  0xd7   :  { %v211_v15 = vpop.f32.mrf.mxu0 }
  0xd8   :  { %117 = vst.msk [vmem:[#allocation2 + $0x8] sm:$0xff] %vm28_vm0, %v114_v14 }
  0xdb   :  { %v121_v17 = vld [vmem:[#allocation2] sm:$0xff] }
  0xdc   :  { %v130_v19 = vadd.f32 %v192_v16, %v121_v17 }
  0xde   :  { %v134_v20 = vadd.f32 %v132_v18, %v130_v19 }
  0xdf   :  { %v122_v21 = vld [vmem:[#allocation2 + $0x8] sm:$0xff] }
  0xe0   :  { %v136_v23 = vsel %vm28_vm0, %v134_v20, 0.0  ;;  %v131_v24 = vadd.f32 %v192_v16, %v122_v21 }
  0xe1   :  { %137 = vadd.xlane.f32.xlu0 %v136_v23 }
  0xe2   :  { %v135_v25 = vadd.f32 %v133_v22, %v131_v24 }
  0xe4   :  { %v139_v26 = vsel %vm28_vm0, %v135_v25, 0.0 }
  0xe5   :  { %140 = vadd.xlane.f32.xlu0 %v139_v26 }
 0x16a   :  { %v138_v27 = vpop.xlane.xlu0 %137 }
 0x16b   :  { %v143_v28 = vmul.f32 0.03125, %v138_v27 }
 0x16d   :  { %v145_v29 = vsub.f32 %v134_v20, %v143_v28 }
 0x16e   :  { %v141_v30 = vpop.xlane.xlu0 %140 }
 0x16f   :  { %v144_v31 = vmul.f32 0.03125, %v141_v30  ;;  %v147_v32 = vmul.f32 %v145_v29, %v145_v29 }
 0x171   :  { %v146_v33 = vsub.f32 %v135_v25, %v144_v31  ;;  %v149_v34 = vsel %vm28_vm0, %v147_v32, 0.0 }
 0x172   :  { %150 = vadd.xlane.f32.xlu1 %v149_v34 }
 0x173   :  { %v148_v35 = vmul.f32 %v146_v33, %v146_v33 }
 0x175   :  { %v152_v36 = vsel %vm28_vm0, %v148_v35, 0.0 }
 0x176   :  { %153 = vadd.xlane.f32.xlu1 %v152_v36 }
 0x1fb   :  { %v151_v37 = vpop.xlane.xlu1 %150 }
 0x1fc   :  { %v155_v38 = vmul.f32 0.03125, %v151_v37 }
 0x1fe   :  { %v157_v39 = vadd.f32 1e-05, %v155_v38 }
 0x1ff   :  { %v154_v40 = vpop.xlane.xlu1 %153 }
 0x200   :  { %218 = vrsqrt.f32 %v157_v39  ;;  %v156_v41 = vmul.f32 0.03125, %v154_v40 }
 0x202   :  { %v158_v42 = vadd.f32 1e-05, %v156_v41 }
 0x204   :  { %220 = vrsqrt.f32 %v158_v42 }
 0x20d   :  { %v219_v43 = vpop.eup %218 }
 0x20e   :  { %v161_v45 = vmul.f32 %v219_v43, %v145_v29 }
 0x210   :  { %v170_v47 = vmul.f32 %v193_v44, %v161_v45 }
 0x211   :  { %v221_v48 = vpop.eup %220 }
 0x212   :  { %v179_v49 = vadd.f32 %v194_v46, %v170_v47  ;;  %v162_v50 = vmul.f32 %v221_v48, %v146_v33 }
 0x214   :  { %181 = vst.msk [vmem:[%s314_s6] sm:$0xff] %vm28_vm0, %v179_v49  ;;  %v171_v51 = vmul.f32 %v193_v44, %v162_v50 }
 0x216   :  { %v180_v52 = vadd.f32 %v194_v46, %v171_v51 }
 0x218   :  { %182 = vst.msk [vmem:[%s314_s6 + $0x8] sm:$0xff] %vm28_vm0, %v180_v52 }

</bundles_post_ra>
